<compile_context>
chip_gen: v7x
topology: tpu7x:2x2x1
jax: 0.10.0
libtpu: 0.0.40
codegen_flags: <defaults>
</compile_context>

<pallas_src>
import numpy as np
import jax
import jax.numpy as jnp
from jax.experimental import pallas as pl
from jax.experimental.pallas import tpu as pltpu

# ----------------------------- tiny-BERT config ------------------------------
VOCAB_SIZE = 128
MAX_POS = 16
TYPE_VOCAB = 2
HIDDEN = 32
NUM_HEADS = 2
HEAD_DIM = HIDDEN // NUM_HEADS
NUM_LAYERS = 2
INTERMEDIATE = 64
NUM_CLASSES = 2
BATCH = 2
SEQ = 8
LN_EPS = 1e-12


# ----------------------- weight-slab layout (import time) --------------------
# One f32 slab of shape [R, 128], organised as four 32-lane strips.  Each entry
# is placed at an 8-aligned row offset; multi-strip entries (96/64-wide) span
# adjacent strips at the same rows.  The layout dict is shared by the packer
# (NumPy, once at init) and the kernel (static slice offsets).
def _build_layout():
    nxt = [0, 0, 0, 0]          # next free row per 32-lane strip
    layout = {}

    def place(name, nrows, strip, nstrips=1):
        r = max(nxt[strip:strip + nstrips])
        r = ((r + 7) // 8) * 8                      # 8-row alignment
        layout[name] = (r, strip * 32, nrows, nstrips * 32)
        for s in range(strip, strip + nstrips):
            nxt[s] = r + nrows

    place("word_emb", VOCAB_SIZE, 0)                # [128, 32]
    place("pos_tiled", BATCH * SEQ, 1)              # [16, 32] (pre-tiled over batch)
    place("tok_emb", TYPE_VOCAB, 1)                 # [2, 32]
    place("emb_ln_g", 1, 1)
    place("emb_ln_b", 1, 1)
    place("pool_w", HIDDEN, 1)                      # [32, 32]
    place("pool_b", 1, 1)
    place("cls_w1", HIDDEN, 2)                      # [32, 16] zero-padded to 32 cols
    place("cls_b1", 1, 2)                           # [16] zero-padded to 32
    place("cls_w2", HIDDEN, 2)                      # [16, 2] zero-padded to [32, 32]
    place("cls_b2", 1, 2)                           # [2] zero-padded to 32
    for l in range(NUM_LAYERS):
        place(f"wqkv_{l}", HIDDEN, 0, 3)            # [32, 96] = wq|wk|wv
        place(f"bqkv_{l}", 1, 0, 3)                 # [1, 96]
        place(f"wo_{l}", HIDDEN, 3)                 # [32, 32]
        place(f"bo_{l}", 1, 3)
        place(f"ln1_g_{l}", 1, 3)
        place(f"ln1_b_{l}", 1, 3)
        place(f"w1_{l}", HIDDEN, 0, 2)              # [32, 64]
        place(f"b1_{l}", 1, 0, 2)                   # [1, 64]
        place(f"w2_{l}", INTERMEDIATE, 2)           # [64, 32]
        place(f"b2_{l}", 1, 2)
        place(f"ln2_g_{l}", 1, 3)
        place(f"ln2_b_{l}", 1, 3)
    total_rows = ((max(nxt) + 7) // 8) * 8
    return layout, total_rows


_LAYOUT, _SLAB_ROWS = _build_layout()


# --------------------------- fully fused Pallas kernel -----------------------
def _bert_fused_kernel(idt_ref, amask_ref, w_ref, o_ref):
    B, S, H, nH, Dh = BATCH, SEQ, HIDDEN, NUM_HEADS, HEAD_DIM

    def ld(name):
        r, c, nr, nc = _LAYOUT[name]
        return w_ref[r:r + nr, c:c + nc]

    def layernorm(x, g, b):
        mu = jnp.mean(x, axis=-1, keepdims=True)
        d = x - mu
        var = jnp.mean(d * d, axis=-1, keepdims=True)
        return d * jax.lax.rsqrt(var + LN_EPS) * g + b

    def gelu(x):
        # tanh-approx GELU (BERT reference uses exact erf-GELU; ~1e-3 delta)
        return 0.5 * x * (1.0 + jnp.tanh(0.7978845608028654 * (x + 0.044715 * x * x * x)))

    # ---- embeddings, fully in-kernel (one-hot matmul replaces the gathers) ----
    idt = idt_ref[...]                                         # [B*S, 2] int32
    ids = idt[:, 0:1]                                          # token ids  [B*S, 1]
    tt = idt[:, 1:2].astype(jnp.float32)                       # type ids   [B*S, 1]
    onehot = (ids == jax.lax.broadcasted_iota(jnp.int32, (B * S, VOCAB_SIZE), 1)
              ).astype(jnp.float32)                            # [B*S, VOCAB]
    tok_tab = ld("tok_emb")                                    # [2, 32]
    x = (jnp.dot(onehot, ld("word_emb"), preferred_element_type=jnp.float32)
         + ld("pos_tiled")
         + tok_tab[0:1, :] + tt * (tok_tab[1:2, :] - tok_tab[0:1, :]))   # [B*S, H]
    x = layernorm(x, ld("emb_ln_g"), ld("emb_ln_b"))

    # additive attention mask rows, hoisted out of the layer/head loops
    neg_mask = (1.0 - amask_ref[...].astype(jnp.float32)) * -10000.0     # [B, S]
    mask_rows = [neg_mask[b:b + 1, :] for b in range(B)]                 # B x [1, S]

    scale = 1.0 / (Dh ** 0.5)
    for l in range(NUM_LAYERS):                                # static unroll (2 layers)
        # Fused QKV projection: one [B*S, H] @ [H, 3H] matmul.
        qkv = (jnp.dot(x, ld(f"wqkv_{l}"), preferred_element_type=jnp.float32)
               + ld(f"bqkv_{l}"))                              # [B*S, 3H]

        # Per-(batch, head) attention, fully unrolled; contexts stay in vregs,
        # heads/batches merged via concatenate, then ONE output projection.
        ctx_batches = []
        for b in range(B):
            r0 = b * S
            ctx_heads = []
            for h in range(nH):
                c0 = h * Dh
                q = qkv[r0:r0 + S, c0:c0 + Dh]                 # [S, Dh]
                k = qkv[r0:r0 + S, H + c0:H + c0 + Dh]         # [S, Dh]
                v = qkv[r0:r0 + S, 2 * H + c0:2 * H + c0 + Dh]
                s = jax.lax.dot_general(
                    q, k, (((1,), (1,)), ((), ())),
                    preferred_element_type=jnp.float32) * scale + mask_rows[b]
                s = s - jnp.max(s, axis=-1, keepdims=True)
                p = jnp.exp(s)
                p = p * pl.reciprocal(jnp.sum(p, axis=-1, keepdims=True), approx=True)
                ctx_heads.append(jnp.dot(p, v, preferred_element_type=jnp.float32))
            ctx_batches.append(jnp.concatenate(ctx_heads, axis=1))        # [S, H]
        attn = jnp.concatenate(ctx_batches, axis=0)                        # [B*S, H]
        attn_out = (jnp.dot(attn, ld(f"wo_{l}"), preferred_element_type=jnp.float32)
                    + ld(f"bo_{l}"))
        x = layernorm(x + attn_out, ld(f"ln1_g_{l}"), ld(f"ln1_b_{l}"))

        # FFN (GELU) + residual + LayerNorm.
        hmid = gelu(jnp.dot(x, ld(f"w1_{l}"), preferred_element_type=jnp.float32)
                    + ld(f"b1_{l}"))
        ffn = (jnp.dot(hmid, ld(f"w2_{l}"), preferred_element_type=jnp.float32)
               + ld(f"b2_{l}"))
        x = layernorm(x + ffn, ld(f"ln2_g_{l}"), ld(f"ln2_b_{l}"))

    # ---- pooler + classifier on the B [CLS] rows only, single output store ----
    cls_rows = jnp.concatenate([x[b * S:b * S + 1, :] for b in range(B)], axis=0)  # [B, H]
    pooled = jnp.tanh(jnp.dot(cls_rows, ld("pool_w"), preferred_element_type=jnp.float32)
                      + ld("pool_b"))
    h1 = jnp.maximum(jnp.dot(pooled, ld("cls_w1"), preferred_element_type=jnp.float32)
                     + ld("cls_b1"), 0.0)                       # [B, 32] (cols 16:32 are 0)
    logits = (jnp.dot(h1, ld("cls_w2"), preferred_element_type=jnp.float32)
              + ld("cls_b2"))                                   # [B, 32] (cols 2:32 junk-free zeros)
    o_ref[...] = logits[:, 0:NUM_CLASSES]


# ------------------------------ parameter init -------------------------------
def _xavier_uniform(key, fan_in, fan_out):
    bound = (6.0 / (fan_in + fan_out)) ** 0.5
    return jax.random.uniform(key, (fan_in, fan_out), jnp.float32, -bound, bound)


def _normal(key, shape, std=0.02):
    return std * jax.random.normal(key, shape, jnp.float32)


def init_params(key):
    keys = iter(jax.random.split(key, 128))
    p = {
        "word_emb": _normal(next(keys), (VOCAB_SIZE, HIDDEN)),
        "pos_emb": _normal(next(keys), (MAX_POS, HIDDEN)),
        "tok_emb": _normal(next(keys), (TYPE_VOCAB, HIDDEN)),
        "emb_ln_g": jnp.ones((HIDDEN,), jnp.float32),
        "emb_ln_b": jnp.zeros((HIDDEN,), jnp.float32),
        "layers": [],
    }
    for _ in range(NUM_LAYERS):
        layer = {
            "wq": _normal(next(keys), (HIDDEN, HIDDEN)),
            "bq": jnp.zeros((HIDDEN,), jnp.float32),
            "wk": _normal(next(keys), (HIDDEN, HIDDEN)),
            "bk": jnp.zeros((HIDDEN,), jnp.float32),
            "wv": _normal(next(keys), (HIDDEN, HIDDEN)),
            "bv": jnp.zeros((HIDDEN,), jnp.float32),
            "wo": _normal(next(keys), (HIDDEN, HIDDEN)),
            "bo": jnp.zeros((HIDDEN,), jnp.float32),
            "ln1_g": jnp.ones((HIDDEN,), jnp.float32),
            "ln1_b": jnp.zeros((HIDDEN,), jnp.float32),
            "w1": _normal(next(keys), (HIDDEN, INTERMEDIATE)),
            "b1": jnp.zeros((INTERMEDIATE,), jnp.float32),
            "w2": _normal(next(keys), (INTERMEDIATE, HIDDEN)),
            "b2": jnp.zeros((HIDDEN,), jnp.float32),
            "ln2_g": jnp.ones((HIDDEN,), jnp.float32),
            "ln2_b": jnp.zeros((HIDDEN,), jnp.float32),
        }
        p["layers"].append(layer)
    # BERT pooler (Linear + tanh over [CLS])
    p["pool_w"] = _normal(next(keys), (HIDDEN, HIDDEN))
    p["pool_b"] = jnp.zeros((HIDDEN,), jnp.float32)
    # classifier head: Linear(H, H//2) -> ReLU -> Linear(H//2, num_classes)
    p["cls_w1"] = _xavier_uniform(next(keys), HIDDEN, HIDDEN // 2)
    p["cls_b1"] = jnp.zeros((HIDDEN // 2,), jnp.float32)
    p["cls_w2"] = _xavier_uniform(next(keys), HIDDEN // 2, NUM_CLASSES)
    p["cls_b2"] = jnp.zeros((NUM_CLASSES,), jnp.float32)
    return p


# ------------------------- one-time weight packing (NumPy) --------------------
def pack_params(params):
    slab = np.zeros((_SLAB_ROWS, 128), np.float32)

    def put(name, arr):
        a = np.asarray(arr, np.float32)
        if a.ndim == 1:
            a = a[None, :]
        r, c, _, _ = _LAYOUT[name]
        slab[r:r + a.shape[0], c:c + a.shape[1]] = a

    put("word_emb", params["word_emb"])
    put("pos_tiled", np.tile(np.asarray(params["pos_emb"])[:SEQ], (BATCH, 1)))
    put("tok_emb", params["tok_emb"])
    put("emb_ln_g", params["emb_ln_g"])
    put("emb_ln_b", params["emb_ln_b"])
    put("pool_w", params["pool_w"])
    put("pool_b", params["pool_b"])
    put("cls_w1", params["cls_w1"])      # zero-padded to [32, 32]
    put("cls_b1", params["cls_b1"])
    put("cls_w2", params["cls_w2"])      # zero-padded to [32, 32]
    put("cls_b2", params["cls_b2"])
    for l, L in enumerate(params["layers"]):
        put(f"wqkv_{l}", np.concatenate(
            [np.asarray(L["wq"]), np.asarray(L["wk"]), np.asarray(L["wv"])], axis=1))
        put(f"bqkv_{l}", np.concatenate(
            [np.asarray(L["bq"]), np.asarray(L["bk"]), np.asarray(L["bv"])]))
        put(f"wo_{l}", L["wo"])
        put(f"bo_{l}", L["bo"])
        put(f"ln1_g_{l}", L["ln1_g"])
        put(f"ln1_b_{l}", L["ln1_b"])
        put(f"w1_{l}", L["w1"])
        put(f"b1_{l}", L["b1"])
        put(f"w2_{l}", L["w2"])
        put(f"b2_{l}", L["b2"])
        put(f"ln2_g_{l}", L["ln2_g"])
        put(f"ln2_b_{l}", L["ln2_b"])
    return jnp.asarray(slab)


# -------------------------------- forward pass --------------------------------
def bert_sentiment_forward(w_slab, input_ids, attention_mask, token_type_ids):
    B, S = input_ids.shape
    # Only per-call glue: flatten/stack the two id vectors (sublane-major).
    idt = jnp.stack([input_ids.reshape(B * S), token_type_ids.reshape(B * S)],
                    axis=-1).astype(jnp.int32)                 # [B*S, 2]
    amask = attention_mask.astype(jnp.int32)                   # [B, S]

    return pl.pallas_call(
        _bert_fused_kernel,
        out_shape=jax.ShapeDtypeStruct((B, NUM_CLASSES), jnp.float32),
        grid=(1,),
        in_specs=[
            pl.BlockSpec((B * S, 2), lambda i: (0, 0)),
            pl.BlockSpec((B, S), lambda i: (0, 0)),
            pl.BlockSpec((_SLAB_ROWS, 128), lambda i: (0, 0)),
        ],
        out_specs=pl.BlockSpec((B, NUM_CLASSES), lambda i: (0, 0)),
        compiler_params=pltpu.CompilerParams(dimension_semantics=("arbitrary",)),
    )(idt, amask, w_slab)


# TODO(synk): Dropout is identity (inference); a training kernel would draw
# masks with pltpu.prng_seed / pltpu.prng_random_bits.

if __name__ == "__main__":
    key = jax.random.PRNGKey(0)
    pkey, ikey = jax.random.split(key)
    params = init_params(pkey)
    w_slab = pack_params(params)          # packed ONCE, outside the jitted forward

    input_ids = jax.random.randint(ikey, (BATCH, SEQ), 0, VOCAB_SIZE, dtype=jnp.int32)
    attention_mask = jnp.ones((BATCH, SEQ), dtype=jnp.int32)
    token_type_ids = jnp.zeros((BATCH, SEQ), dtype=jnp.int32)

    fwd = jax.jit(bert_sentiment_forward)
    logits = fwd(w_slab, input_ids, attention_mask, token_type_ids)
    logits = jax.block_until_ready(logits)
    assert logits.shape == (BATCH, NUM_CLASSES)
    assert bool(jnp.all(jnp.isfinite(logits)))
    print("KERNEL_OK")
</pallas_src>

<mosaic_0001>
module attributes {stable_mosaic.version = 11 : i64} {
  func.func @_bert_fused_kernel(%arg0: i32, %arg1: memref<16x2xi32, #tpu.memory_space<vmem>>, %arg2: memref<2x8xi32, #tpu.memory_space<vmem>>, %arg3: memref<352x128xf32, #tpu.memory_space<vmem>>, %arg4: memref<2x2xf32, #tpu.memory_space<vmem>>) attributes {dimension_semantics = [#tpu.dimension_semantics<arbitrary>], iteration_bounds = array<i64: 1>, scalar_prefetch = 0 : i64, scratch_operands = 0 : i64, tpu.core_type = #tpu.core_type<tc>, window_params = [{pipeline_mode = #tpu.pipeline_mode<synchronous>, transform_indices = @transform_0, window_bounds = array<i64: 16, 2>}, {pipeline_mode = #tpu.pipeline_mode<synchronous>, transform_indices = @transform_1, window_bounds = array<i64: 2, 8>}, {pipeline_mode = #tpu.pipeline_mode<synchronous>, transform_indices = @transform_2, window_bounds = array<i64: 352, 128>}, {pipeline_mode = #tpu.pipeline_mode<synchronous>, transform_indices = @transform_3, window_bounds = array<i64: 2, 2>}]} {
    %c0 = arith.constant 0 : index
    %c0_0 = arith.constant 0 : index
    %0 = vector.load %arg1[%c0, %c0_0] : memref<16x2xi32, #tpu.memory_space<vmem>>, vector<16x2xi32>
    %1 = vector.extract_strided_slice %0 {offsets = [0, 0], sizes = [16, 1], strides = [1, 1]} : vector<16x2xi32> to vector<16x1xi32>
    %2 = vector.extract_strided_slice %0 {offsets = [0, 1], sizes = [16, 1], strides = [1, 1]} : vector<16x2xi32> to vector<16x1xi32>
    %3 = arith.sitofp %2 : vector<16x1xi32> to vector<16x1xf32>
    %4 = tpu.iota {dimensions = array<i32: 1>} : vector<16x128xi32>
    %5 = vector.broadcast %1 : vector<16x1xi32> to vector<16x128xi32>
    %6 = arith.cmpi eq, %5, %4 : vector<16x128xi32>
    %7 = arith.extui %6 : vector<16x128xi1> to vector<16x128xi32>
    %8 = arith.sitofp %7 : vector<16x128xi32> to vector<16x128xf32>
    %c16 = arith.constant 16 : index
    %c32 = arith.constant 32 : index
    %9 = vector.load %arg3[%c16, %c32] : memref<352x128xf32, #tpu.memory_space<vmem>>, vector<2x32xf32>
    %c0_1 = arith.constant 0 : index
    %c0_2 = arith.constant 0 : index
    %10 = vector.load %arg3[%c0_1, %c0_2] : memref<352x128xf32, #tpu.memory_space<vmem>>, vector<128x32xf32>
    %cst = arith.constant dense<0.000000e+00> : vector<16x32xf32>
    %11 = tpu.matmul %8, %10, %cst {dimension_numbers = #tpu.dot_dimension_numbers<[1], [0], [0], [1], [0, 0, 1, 1], [], []>} : vector<16x128xf32>, vector<128x32xf32>, vector<16x32xf32> -> vector<16x32xf32>
    %c0_3 = arith.constant 0 : index
    %c32_4 = arith.constant 32 : index
    %12 = vector.load %arg3[%c0_3, %c32_4] : memref<352x128xf32, #tpu.memory_space<vmem>>, vector<16x32xf32>
    %13 = arith.addf %11, %12 : vector<16x32xf32>
    %14 = vector.extract_strided_slice %9 {offsets = [0, 0], sizes = [1, 32], strides = [1, 1]} : vector<2x32xf32> to vector<1x32xf32>
    %15 = vector.broadcast %14 : vector<1x32xf32> to vector<16x32xf32>
    %16 = arith.addf %13, %15 : vector<16x32xf32>
    %17 = vector.extract_strided_slice %9 {offsets = [1, 0], sizes = [1, 32], strides = [1, 1]} : vector<2x32xf32> to vector<1x32xf32>
    %18 = vector.extract_strided_slice %9 {offsets = [0, 0], sizes = [1, 32], strides = [1, 1]} : vector<2x32xf32> to vector<1x32xf32>
    %19 = arith.subf %17, %18 : vector<1x32xf32>
    %20 = vector.broadcast %3 : vector<16x1xf32> to vector<16x32xf32>
    %21 = vector.broadcast %19 : vector<1x32xf32> to vector<16x32xf32>
    %22 = arith.mulf %20, %21 : vector<16x32xf32>
    %23 = arith.addf %16, %22 : vector<16x32xf32>
    %c24 = arith.constant 24 : index
    %c32_5 = arith.constant 32 : index
    %24 = vector.load %arg3[%c24, %c32_5] : memref<352x128xf32, #tpu.memory_space<vmem>>, vector<1x32xf32>
    %c32_6 = arith.constant 32 : index
    %c32_7 = arith.constant 32 : index
    %25 = vector.load %arg3[%c32_6, %c32_7] : memref<352x128xf32, #tpu.memory_space<vmem>>, vector<1x32xf32>
    %cst_8 = arith.constant dense<0.000000e+00> : vector<16xf32>
    %26 = vector.multi_reduction <add>, %23, %cst_8 [1] : vector<16x32xf32> to vector<16xf32>
    %27 = vector.shape_cast %26 : vector<16xf32> to vector<16x1xf32>
    %cst_9 = arith.constant 3.200000e+01 : f32
    %28 = vector.broadcast %cst_9 : f32 to vector<16x1xf32>
    %29 = arith.divf %27, %28 : vector<16x1xf32>
    %30 = vector.broadcast %29 : vector<16x1xf32> to vector<16x32xf32>
    %31 = arith.subf %23, %30 : vector<16x32xf32>
    %32 = arith.mulf %31, %31 : vector<16x32xf32>
    %cst_10 = arith.constant dense<0.000000e+00> : vector<16xf32>
    %33 = vector.multi_reduction <add>, %32, %cst_10 [1] : vector<16x32xf32> to vector<16xf32>
    %34 = vector.shape_cast %33 : vector<16xf32> to vector<16x1xf32>
    %cst_11 = arith.constant 3.200000e+01 : f32
    %35 = vector.broadcast %cst_11 : f32 to vector<16x1xf32>
    %36 = arith.divf %34, %35 : vector<16x1xf32>
    %cst_12 = arith.constant 9.99999996E-13 : f32
    %37 = vector.broadcast %cst_12 : f32 to vector<16x1xf32>
    %38 = arith.addf %36, %37 : vector<16x1xf32>
    %39 = math.rsqrt %38 : vector<16x1xf32>
    %40 = vector.broadcast %39 : vector<16x1xf32> to vector<16x32xf32>
    %41 = arith.mulf %31, %40 : vector<16x32xf32>
    %42 = vector.broadcast %24 : vector<1x32xf32> to vector<16x32xf32>
    %43 = arith.mulf %41, %42 : vector<16x32xf32>
    %44 = vector.broadcast %25 : vector<1x32xf32> to vector<16x32xf32>
    %45 = arith.addf %43, %44 : vector<16x32xf32>
    %c0_13 = arith.constant 0 : index
    %c0_14 = arith.constant 0 : index
    %46 = vector.load %arg2[%c0_13, %c0_14] : memref<2x8xi32, #tpu.memory_space<vmem>>, vector<2x8xi32>
    %47 = arith.sitofp %46 : vector<2x8xi32> to vector<2x8xf32>
    %cst_15 = arith.constant 1.000000e+00 : f32
    %48 = vector.broadcast %cst_15 : f32 to vector<2x8xf32>
    %49 = arith.subf %48, %47 : vector<2x8xf32>
    %cst_16 = arith.constant -1.000000e+04 : f32
    %50 = vector.broadcast %cst_16 : f32 to vector<2x8xf32>
    %51 = arith.mulf %49, %50 : vector<2x8xf32>
    %52 = vector.extract_strided_slice %51 {offsets = [0, 0], sizes = [1, 8], strides = [1, 1]} : vector<2x8xf32> to vector<1x8xf32>
    %53 = vector.extract_strided_slice %51 {offsets = [1, 0], sizes = [1, 8], strides = [1, 1]} : vector<2x8xf32> to vector<1x8xf32>
    %c128 = arith.constant 128 : index
    %c0_17 = arith.constant 0 : index
    %54 = vector.load %arg3[%c128, %c0_17] : memref<352x128xf32, #tpu.memory_space<vmem>>, vector<32x96xf32>
    %cst_18 = arith.constant dense<0.000000e+00> : vector<16x96xf32>
    %55 = tpu.matmul %45, %54, %cst_18 {dimension_numbers = #tpu.dot_dimension_numbers<[1], [0], [0], [1], [0, 0, 1, 1], [], []>} : vector<16x32xf32>, vector<32x96xf32>, vector<16x96xf32> -> vector<16x96xf32>
    %c160 = arith.constant 160 : index
    %c0_19 = arith.constant 0 : index
    %56 = vector.load %arg3[%c160, %c0_19] : memref<352x128xf32, #tpu.memory_space<vmem>>, vector<1x96xf32>
    %57 = vector.broadcast %56 : vector<1x96xf32> to vector<16x96xf32>
    %58 = arith.addf %55, %57 : vector<16x96xf32>
    %59 = vector.extract_strided_slice %58 {offsets = [0, 0], sizes = [8, 16], strides = [1, 1]} : vector<16x96xf32> to vector<8x16xf32>
    %60 = vector.extract_strided_slice %58 {offsets = [0, 32], sizes = [8, 16], strides = [1, 1]} : vector<16x96xf32> to vector<8x16xf32>
    %61 = vector.extract_strided_slice %58 {offsets = [0, 64], sizes = [8, 16], strides = [1, 1]} : vector<16x96xf32> to vector<8x16xf32>
    %cst_20 = arith.constant dense<0.000000e+00> : vector<8x8xf32>
    %62 = tpu.matmul %59, %60, %cst_20 {dimension_numbers = #tpu.dot_dimension_numbers<[1], [1], [0], [0], [0, 0, 1, 0], [], []>} : vector<8x16xf32>, vector<8x16xf32>, vector<8x8xf32> -> vector<8x8xf32>
    %cst_21 = arith.constant 2.500000e-01 : f32
    %63 = vector.broadcast %cst_21 : f32 to vector<8x8xf32>
    %64 = arith.mulf %62, %63 : vector<8x8xf32>
    %65 = vector.broadcast %52 : vector<1x8xf32> to vector<8x8xf32>
    %66 = arith.addf %64, %65 : vector<8x8xf32>
    %cst_22 = arith.constant dense<0xFF800000> : vector<8xf32>
    %67 = vector.multi_reduction <maximumf>, %66, %cst_22 [1] : vector<8x8xf32> to vector<8xf32>
    %68 = vector.shape_cast %67 : vector<8xf32> to vector<8x1xf32>
    %69 = vector.broadcast %68 : vector<8x1xf32> to vector<8x8xf32>
    %70 = arith.subf %66, %69 : vector<8x8xf32>
    %71 = math.exp %70 : vector<8x8xf32>
    %cst_23 = arith.constant dense<0.000000e+00> : vector<8xf32>
    %72 = vector.multi_reduction <add>, %71, %cst_23 [1] : vector<8x8xf32> to vector<8xf32>
    %73 = vector.shape_cast %72 : vector<8xf32> to vector<8x1xf32>
    %74 = tpu.reciprocal %73 {approx = true} : vector<8x1xf32> -> vector<8x1xf32>
    %75 = vector.broadcast %74 : vector<8x1xf32> to vector<8x8xf32>
    %76 = arith.mulf %71, %75 : vector<8x8xf32>
    %cst_24 = arith.constant dense<0.000000e+00> : vector<8x16xf32>
    %77 = tpu.matmul %76, %61, %cst_24 {dimension_numbers = #tpu.dot_dimension_numbers<[1], [0], [0], [1], [0, 0, 1, 1], [], []>} : vector<8x8xf32>, vector<8x16xf32>, vector<8x16xf32> -> vector<8x16xf32>
    %78 = vector.extract_strided_slice %58 {offsets = [0, 16], sizes = [8, 16], strides = [1, 1]} : vector<16x96xf32> to vector<8x16xf32>
    %79 = vector.extract_strided_slice %58 {offsets = [0, 48], sizes = [8, 16], strides = [1, 1]} : vector<16x96xf32> to vector<8x16xf32>
    %80 = vector.extract_strided_slice %58 {offsets = [0, 80], sizes = [8, 16], strides = [1, 1]} : vector<16x96xf32> to vector<8x16xf32>
    %cst_25 = arith.constant dense<0.000000e+00> : vector<8x8xf32>
    %81 = tpu.matmul %78, %79, %cst_25 {dimension_numbers = #tpu.dot_dimension_numbers<[1], [1], [0], [0], [0, 0, 1, 0], [], []>} : vector<8x16xf32>, vector<8x16xf32>, vector<8x8xf32> -> vector<8x8xf32>
    %cst_26 = arith.constant 2.500000e-01 : f32
    %82 = vector.broadcast %cst_26 : f32 to vector<8x8xf32>
    %83 = arith.mulf %81, %82 : vector<8x8xf32>
    %84 = vector.broadcast %52 : vector<1x8xf32> to vector<8x8xf32>
    %85 = arith.addf %83, %84 : vector<8x8xf32>
    %cst_27 = arith.constant dense<0xFF800000> : vector<8xf32>
    %86 = vector.multi_reduction <maximumf>, %85, %cst_27 [1] : vector<8x8xf32> to vector<8xf32>
    %87 = vector.shape_cast %86 : vector<8xf32> to vector<8x1xf32>
    %88 = vector.broadcast %87 : vector<8x1xf32> to vector<8x8xf32>
    %89 = arith.subf %85, %88 : vector<8x8xf32>
    %90 = math.exp %89 : vector<8x8xf32>
    %cst_28 = arith.constant dense<0.000000e+00> : vector<8xf32>
    %91 = vector.multi_reduction <add>, %90, %cst_28 [1] : vector<8x8xf32> to vector<8xf32>
    %92 = vector.shape_cast %91 : vector<8xf32> to vector<8x1xf32>
    %93 = tpu.reciprocal %92 {approx = true} : vector<8x1xf32> -> vector<8x1xf32>
    %94 = vector.broadcast %93 : vector<8x1xf32> to vector<8x8xf32>
    %95 = arith.mulf %90, %94 : vector<8x8xf32>
    %cst_29 = arith.constant dense<0.000000e+00> : vector<8x16xf32>
    %96 = tpu.matmul %95, %80, %cst_29 {dimension_numbers = #tpu.dot_dimension_numbers<[1], [0], [0], [1], [0, 0, 1, 1], [], []>} : vector<8x8xf32>, vector<8x16xf32>, vector<8x16xf32> -> vector<8x16xf32>
    %97 = tpu.concatenate %77, %96 in 1 : vector<8x16xf32>, vector<8x16xf32> -> vector<8x32xf32>
    %98 = vector.extract_strided_slice %58 {offsets = [8, 0], sizes = [8, 16], strides = [1, 1]} : vector<16x96xf32> to vector<8x16xf32>
    %99 = vector.extract_strided_slice %58 {offsets = [8, 32], sizes = [8, 16], strides = [1, 1]} : vector<16x96xf32> to vector<8x16xf32>
    %100 = vector.extract_strided_slice %58 {offsets = [8, 64], sizes = [8, 16], strides = [1, 1]} : vector<16x96xf32> to vector<8x16xf32>
    %cst_30 = arith.constant dense<0.000000e+00> : vector<8x8xf32>
    %101 = tpu.matmul %98, %99, %cst_30 {dimension_numbers = #tpu.dot_dimension_numbers<[1], [1], [0], [0], [0, 0, 1, 0], [], []>} : vector<8x16xf32>, vector<8x16xf32>, vector<8x8xf32> -> vector<8x8xf32>
    %cst_31 = arith.constant 2.500000e-01 : f32
    %102 = vector.broadcast %cst_31 : f32 to vector<8x8xf32>
    %103 = arith.mulf %101, %102 : vector<8x8xf32>
    %104 = vector.broadcast %53 : vector<1x8xf32> to vector<8x8xf32>
    %105 = arith.addf %103, %104 : vector<8x8xf32>
    %cst_32 = arith.constant dense<0xFF800000> : vector<8xf32>
    %106 = vector.multi_reduction <maximumf>, %105, %cst_32 [1] : vector<8x8xf32> to vector<8xf32>
    %107 = vector.shape_cast %106 : vector<8xf32> to vector<8x1xf32>
    %108 = vector.broadcast %107 : vector<8x1xf32> to vector<8x8xf32>
    %109 = arith.subf %105, %108 : vector<8x8xf32>
    %110 = math.exp %109 : vector<8x8xf32>
    %cst_33 = arith.constant dense<0.000000e+00> : vector<8xf32>
    %111 = vector.multi_reduction <add>, %110, %cst_33 [1] : vector<8x8xf32> to vector<8xf32>
    %112 = vector.shape_cast %111 : vector<8xf32> to vector<8x1xf32>
    %113 = tpu.reciprocal %112 {approx = true} : vector<8x1xf32> -> vector<8x1xf32>
    %114 = vector.broadcast %113 : vector<8x1xf32> to vector<8x8xf32>
    %115 = arith.mulf %110, %114 : vector<8x8xf32>
    %cst_34 = arith.constant dense<0.000000e+00> : vector<8x16xf32>
    %116 = tpu.matmul %115, %100, %cst_34 {dimension_numbers = #tpu.dot_dimension_numbers<[1], [0], [0], [1], [0, 0, 1, 1], [], []>} : vector<8x8xf32>, vector<8x16xf32>, vector<8x16xf32> -> vector<8x16xf32>
    %117 = vector.extract_strided_slice %58 {offsets = [8, 16], sizes = [8, 16], strides = [1, 1]} : vector<16x96xf32> to vector<8x16xf32>
    %118 = vector.extract_strided_slice %58 {offsets = [8, 48], sizes = [8, 16], strides = [1, 1]} : vector<16x96xf32> to vector<8x16xf32>
    %119 = vector.extract_strided_slice %58 {offsets = [8, 80], sizes = [8, 16], strides = [1, 1]} : vector<16x96xf32> to vector<8x16xf32>
    %cst_35 = arith.constant dense<0.000000e+00> : vector<8x8xf32>
    %120 = tpu.matmul %117, %118, %cst_35 {dimension_numbers = #tpu.dot_dimension_numbers<[1], [1], [0], [0], [0, 0, 1, 0], [], []>} : vector<8x16xf32>, vector<8x16xf32>, vector<8x8xf32> -> vector<8x8xf32>
    %cst_36 = arith.constant 2.500000e-01 : f32
    %121 = vector.broadcast %cst_36 : f32 to vector<8x8xf32>
    %122 = arith.mulf %120, %121 : vector<8x8xf32>
    %123 = vector.broadcast %53 : vector<1x8xf32> to vector<8x8xf32>
    %124 = arith.addf %122, %123 : vector<8x8xf32>
    %cst_37 = arith.constant dense<0xFF800000> : vector<8xf32>
    %125 = vector.multi_reduction <maximumf>, %124, %cst_37 [1] : vector<8x8xf32> to vector<8xf32>
    %126 = vector.shape_cast %125 : vector<8xf32> to vector<8x1xf32>
    %127 = vector.broadcast %126 : vector<8x1xf32> to vector<8x8xf32>
    %128 = arith.subf %124, %127 : vector<8x8xf32>
    %129 = math.exp %128 : vector<8x8xf32>
    %cst_38 = arith.constant dense<0.000000e+00> : vector<8xf32>
    %130 = vector.multi_reduction <add>, %129, %cst_38 [1] : vector<8x8xf32> to vector<8xf32>
    %131 = vector.shape_cast %130 : vector<8xf32> to vector<8x1xf32>
    %132 = tpu.reciprocal %131 {approx = true} : vector<8x1xf32> -> vector<8x1xf32>
    %133 = vector.broadcast %132 : vector<8x1xf32> to vector<8x8xf32>
    %134 = arith.mulf %129, %133 : vector<8x8xf32>
    %cst_39 = arith.constant dense<0.000000e+00> : vector<8x16xf32>
    %135 = tpu.matmul %134, %119, %cst_39 {dimension_numbers = #tpu.dot_dimension_numbers<[1], [0], [0], [1], [0, 0, 1, 1], [], []>} : vector<8x8xf32>, vector<8x16xf32>, vector<8x16xf32> -> vector<8x16xf32>
    %136 = tpu.concatenate %116, %135 in 1 : vector<8x16xf32>, vector<8x16xf32> -> vector<8x32xf32>
    %137 = tpu.concatenate %97, %136 in 0 : vector<8x32xf32>, vector<8x32xf32> -> vector<16x32xf32>
    %c0_40 = arith.constant 0 : index
    %c96 = arith.constant 96 : index
    %138 = vector.load %arg3[%c0_40, %c96] : memref<352x128xf32, #tpu.memory_space<vmem>>, vector<32x32xf32>
    %cst_41 = arith.constant dense<0.000000e+00> : vector<16x32xf32>
    %139 = tpu.matmul %137, %138, %cst_41 {dimension_numbers = #tpu.dot_dimension_numbers<[1], [0], [0], [1], [0, 0, 1, 1], [], []>} : vector<16x32xf32>, vector<32x32xf32>, vector<16x32xf32> -> vector<16x32xf32>
    %c32_42 = arith.constant 32 : index
    %c96_43 = arith.constant 96 : index
    %140 = vector.load %arg3[%c32_42, %c96_43] : memref<352x128xf32, #tpu.memory_space<vmem>>, vector<1x32xf32>
    %141 = vector.broadcast %140 : vector<1x32xf32> to vector<16x32xf32>
    %142 = arith.addf %139, %141 : vector<16x32xf32>
    %143 = arith.addf %45, %142 : vector<16x32xf32>
    %c40 = arith.constant 40 : index
    %c96_44 = arith.constant 96 : index
    %144 = vector.load %arg3[%c40, %c96_44] : memref<352x128xf32, #tpu.memory_space<vmem>>, vector<1x32xf32>
    %c48 = arith.constant 48 : index
    %c96_45 = arith.constant 96 : index
    %145 = vector.load %arg3[%c48, %c96_45] : memref<352x128xf32, #tpu.memory_space<vmem>>, vector<1x32xf32>
    %cst_46 = arith.constant dense<0.000000e+00> : vector<16xf32>
    %146 = vector.multi_reduction <add>, %143, %cst_46 [1] : vector<16x32xf32> to vector<16xf32>
    %147 = vector.shape_cast %146 : vector<16xf32> to vector<16x1xf32>
    %cst_47 = arith.constant 3.200000e+01 : f32
    %148 = vector.broadcast %cst_47 : f32 to vector<16x1xf32>
    %149 = arith.divf %147, %148 : vector<16x1xf32>
    %150 = vector.broadcast %149 : vector<16x1xf32> to vector<16x32xf32>
    %151 = arith.subf %143, %150 : vector<16x32xf32>
    %152 = arith.mulf %151, %151 : vector<16x32xf32>
    %cst_48 = arith.constant dense<0.000000e+00> : vector<16xf32>
    %153 = vector.multi_reduction <add>, %152, %cst_48 [1] : vector<16x32xf32> to vector<16xf32>
    %154 = vector.shape_cast %153 : vector<16xf32> to vector<16x1xf32>
    %cst_49 = arith.constant 3.200000e+01 : f32
    %155 = vector.broadcast %cst_49 : f32 to vector<16x1xf32>
    %156 = arith.divf %154, %155 : vector<16x1xf32>
    %cst_50 = arith.constant 9.99999996E-13 : f32
    %157 = vector.broadcast %cst_50 : f32 to vector<16x1xf32>
    %158 = arith.addf %156, %157 : vector<16x1xf32>
    %159 = math.rsqrt %158 : vector<16x1xf32>
    %160 = vector.broadcast %159 : vector<16x1xf32> to vector<16x32xf32>
    %161 = arith.mulf %151, %160 : vector<16x32xf32>
    %162 = vector.broadcast %144 : vector<1x32xf32> to vector<16x32xf32>
    %163 = arith.mulf %161, %162 : vector<16x32xf32>
    %164 = vector.broadcast %145 : vector<1x32xf32> to vector<16x32xf32>
    %165 = arith.addf %163, %164 : vector<16x32xf32>
    %c168 = arith.constant 168 : index
    %c0_51 = arith.constant 0 : index
    %166 = vector.load %arg3[%c168, %c0_51] : memref<352x128xf32, #tpu.memory_space<vmem>>, vector<32x64xf32>
    %cst_52 = arith.constant dense<0.000000e+00> : vector<16x64xf32>
    %167 = tpu.matmul %165, %166, %cst_52 {dimension_numbers = #tpu.dot_dimension_numbers<[1], [0], [0], [1], [0, 0, 1, 1], [], []>} : vector<16x32xf32>, vector<32x64xf32>, vector<16x64xf32> -> vector<16x64xf32>
    %c200 = arith.constant 200 : index
    %c0_53 = arith.constant 0 : index
    %168 = vector.load %arg3[%c200, %c0_53] : memref<352x128xf32, #tpu.memory_space<vmem>>, vector<1x64xf32>
    %169 = vector.broadcast %168 : vector<1x64xf32> to vector<16x64xf32>
    %170 = arith.addf %167, %169 : vector<16x64xf32>
    %cst_54 = arith.constant 5.000000e-01 : f32
    %171 = vector.broadcast %cst_54 : f32 to vector<16x64xf32>
    %172 = arith.mulf %171, %170 : vector<16x64xf32>
    %cst_55 = arith.constant 4.471500e-02 : f32
    %173 = vector.broadcast %cst_55 : f32 to vector<16x64xf32>
    %174 = arith.mulf %173, %170 : vector<16x64xf32>
    %175 = arith.mulf %174, %170 : vector<16x64xf32>
    %176 = arith.mulf %175, %170 : vector<16x64xf32>
    %177 = arith.addf %170, %176 : vector<16x64xf32>
    %cst_56 = arith.constant 0.797884583 : f32
    %178 = vector.broadcast %cst_56 : f32 to vector<16x64xf32>
    %179 = arith.mulf %178, %177 : vector<16x64xf32>
    %180 = math.tanh %179 : vector<16x64xf32>
    %cst_57 = arith.constant 1.000000e+00 : f32
    %181 = vector.broadcast %cst_57 : f32 to vector<16x64xf32>
    %182 = arith.addf %181, %180 : vector<16x64xf32>
    %183 = arith.mulf %172, %182 : vector<16x64xf32>
    %c168_58 = arith.constant 168 : index
    %c64 = arith.constant 64 : index
    %184 = vector.load %arg3[%c168_58, %c64] : memref<352x128xf32, #tpu.memory_space<vmem>>, vector<64x32xf32>
    %cst_59 = arith.constant dense<0.000000e+00> : vector<16x32xf32>
    %185 = tpu.matmul %183, %184, %cst_59 {dimension_numbers = #tpu.dot_dimension_numbers<[1], [0], [0], [1], [0, 0, 1, 1], [], []>} : vector<16x64xf32>, vector<64x32xf32>, vector<16x32xf32> -> vector<16x32xf32>
    %c232 = arith.constant 232 : index
    %c64_60 = arith.constant 64 : index
    %186 = vector.load %arg3[%c232, %c64_60] : memref<352x128xf32, #tpu.memory_space<vmem>>, vector<1x32xf32>
    %187 = vector.broadcast %186 : vector<1x32xf32> to vector<16x32xf32>
    %188 = arith.addf %185, %187 : vector<16x32xf32>
    %189 = arith.addf %165, %188 : vector<16x32xf32>
    %c56 = arith.constant 56 : index
    %c96_61 = arith.constant 96 : index
    %190 = vector.load %arg3[%c56, %c96_61] : memref<352x128xf32, #tpu.memory_space<vmem>>, vector<1x32xf32>
    %c64_62 = arith.constant 64 : index
    %c96_63 = arith.constant 96 : index
    %191 = vector.load %arg3[%c64_62, %c96_63] : memref<352x128xf32, #tpu.memory_space<vmem>>, vector<1x32xf32>
    %cst_64 = arith.constant dense<0.000000e+00> : vector<16xf32>
    %192 = vector.multi_reduction <add>, %189, %cst_64 [1] : vector<16x32xf32> to vector<16xf32>
    %193 = vector.shape_cast %192 : vector<16xf32> to vector<16x1xf32>
    %cst_65 = arith.constant 3.200000e+01 : f32
    %194 = vector.broadcast %cst_65 : f32 to vector<16x1xf32>
    %195 = arith.divf %193, %194 : vector<16x1xf32>
    %196 = vector.broadcast %195 : vector<16x1xf32> to vector<16x32xf32>
    %197 = arith.subf %189, %196 : vector<16x32xf32>
    %198 = arith.mulf %197, %197 : vector<16x32xf32>
    %cst_66 = arith.constant dense<0.000000e+00> : vector<16xf32>
    %199 = vector.multi_reduction <add>, %198, %cst_66 [1] : vector<16x32xf32> to vector<16xf32>
    %200 = vector.shape_cast %199 : vector<16xf32> to vector<16x1xf32>
    %cst_67 = arith.constant 3.200000e+01 : f32
    %201 = vector.broadcast %cst_67 : f32 to vector<16x1xf32>
    %202 = arith.divf %200, %201 : vector<16x1xf32>
    %cst_68 = arith.constant 9.99999996E-13 : f32
    %203 = vector.broadcast %cst_68 : f32 to vector<16x1xf32>
    %204 = arith.addf %202, %203 : vector<16x1xf32>
    %205 = math.rsqrt %204 : vector<16x1xf32>
    %206 = vector.broadcast %205 : vector<16x1xf32> to vector<16x32xf32>
    %207 = arith.mulf %197, %206 : vector<16x32xf32>
    %208 = vector.broadcast %190 : vector<1x32xf32> to vector<16x32xf32>
    %209 = arith.mulf %207, %208 : vector<16x32xf32>
    %210 = vector.broadcast %191 : vector<1x32xf32> to vector<16x32xf32>
    %211 = arith.addf %209, %210 : vector<16x32xf32>
    %c240 = arith.constant 240 : index
    %c0_69 = arith.constant 0 : index
    %212 = vector.load %arg3[%c240, %c0_69] : memref<352x128xf32, #tpu.memory_space<vmem>>, vector<32x96xf32>
    %cst_70 = arith.constant dense<0.000000e+00> : vector<16x96xf32>
    %213 = tpu.matmul %211, %212, %cst_70 {dimension_numbers = #tpu.dot_dimension_numbers<[1], [0], [0], [1], [0, 0, 1, 1], [], []>} : vector<16x32xf32>, vector<32x96xf32>, vector<16x96xf32> -> vector<16x96xf32>
    %c272 = arith.constant 272 : index
    %c0_71 = arith.constant 0 : index
    %214 = vector.load %arg3[%c272, %c0_71] : memref<352x128xf32, #tpu.memory_space<vmem>>, vector<1x96xf32>
    %215 = vector.broadcast %214 : vector<1x96xf32> to vector<16x96xf32>
    %216 = arith.addf %213, %215 : vector<16x96xf32>
    %217 = vector.extract_strided_slice %216 {offsets = [0, 0], sizes = [8, 16], strides = [1, 1]} : vector<16x96xf32> to vector<8x16xf32>
    %218 = vector.extract_strided_slice %216 {offsets = [0, 32], sizes = [8, 16], strides = [1, 1]} : vector<16x96xf32> to vector<8x16xf32>
    %219 = vector.extract_strided_slice %216 {offsets = [0, 64], sizes = [8, 16], strides = [1, 1]} : vector<16x96xf32> to vector<8x16xf32>
    %cst_72 = arith.constant dense<0.000000e+00> : vector<8x8xf32>
    %220 = tpu.matmul %217, %218, %cst_72 {dimension_numbers = #tpu.dot_dimension_numbers<[1], [1], [0], [0], [0, 0, 1, 0], [], []>} : vector<8x16xf32>, vector<8x16xf32>, vector<8x8xf32> -> vector<8x8xf32>
    %cst_73 = arith.constant 2.500000e-01 : f32
    %221 = vector.broadcast %cst_73 : f32 to vector<8x8xf32>
    %222 = arith.mulf %220, %221 : vector<8x8xf32>
    %223 = vector.broadcast %52 : vector<1x8xf32> to vector<8x8xf32>
    %224 = arith.addf %222, %223 : vector<8x8xf32>
    %cst_74 = arith.constant dense<0xFF800000> : vector<8xf32>
    %225 = vector.multi_reduction <maximumf>, %224, %cst_74 [1] : vector<8x8xf32> to vector<8xf32>
    %226 = vector.shape_cast %225 : vector<8xf32> to vector<8x1xf32>
    %227 = vector.broadcast %226 : vector<8x1xf32> to vector<8x8xf32>
    %228 = arith.subf %224, %227 : vector<8x8xf32>
    %229 = math.exp %228 : vector<8x8xf32>
    %cst_75 = arith.constant dense<0.000000e+00> : vector<8xf32>
    %230 = vector.multi_reduction <add>, %229, %cst_75 [1] : vector<8x8xf32> to vector<8xf32>
    %231 = vector.shape_cast %230 : vector<8xf32> to vector<8x1xf32>
    %232 = tpu.reciprocal %231 {approx = true} : vector<8x1xf32> -> vector<8x1xf32>
    %233 = vector.broadcast %232 : vector<8x1xf32> to vector<8x8xf32>
    %234 = arith.mulf %229, %233 : vector<8x8xf32>
    %cst_76 = arith.constant dense<0.000000e+00> : vector<8x16xf32>
    %235 = tpu.matmul %234, %219, %cst_76 {dimension_numbers = #tpu.dot_dimension_numbers<[1], [0], [0], [1], [0, 0, 1, 1], [], []>} : vector<8x8xf32>, vector<8x16xf32>, vector<8x16xf32> -> vector<8x16xf32>
    %236 = vector.extract_strided_slice %216 {offsets = [0, 16], sizes = [8, 16], strides = [1, 1]} : vector<16x96xf32> to vector<8x16xf32>
    %237 = vector.extract_strided_slice %216 {offsets = [0, 48], sizes = [8, 16], strides = [1, 1]} : vector<16x96xf32> to vector<8x16xf32>
    %238 = vector.extract_strided_slice %216 {offsets = [0, 80], sizes = [8, 16], strides = [1, 1]} : vector<16x96xf32> to vector<8x16xf32>
    %cst_77 = arith.constant dense<0.000000e+00> : vector<8x8xf32>
    %239 = tpu.matmul %236, %237, %cst_77 {dimension_numbers = #tpu.dot_dimension_numbers<[1], [1], [0], [0], [0, 0, 1, 0], [], []>} : vector<8x16xf32>, vector<8x16xf32>, vector<8x8xf32> -> vector<8x8xf32>
    %cst_78 = arith.constant 2.500000e-01 : f32
    %240 = vector.broadcast %cst_78 : f32 to vector<8x8xf32>
    %241 = arith.mulf %239, %240 : vector<8x8xf32>
    %242 = vector.broadcast %52 : vector<1x8xf32> to vector<8x8xf32>
    %243 = arith.addf %241, %242 : vector<8x8xf32>
    %cst_79 = arith.constant dense<0xFF800000> : vector<8xf32>
    %244 = vector.multi_reduction <maximumf>, %243, %cst_79 [1] : vector<8x8xf32> to vector<8xf32>
    %245 = vector.shape_cast %244 : vector<8xf32> to vector<8x1xf32>
    %246 = vector.broadcast %245 : vector<8x1xf32> to vector<8x8xf32>
    %247 = arith.subf %243, %246 : vector<8x8xf32>
    %248 = math.exp %247 : vector<8x8xf32>
    %cst_80 = arith.constant dense<0.000000e+00> : vector<8xf32>
    %249 = vector.multi_reduction <add>, %248, %cst_80 [1] : vector<8x8xf32> to vector<8xf32>
    %250 = vector.shape_cast %249 : vector<8xf32> to vector<8x1xf32>
    %251 = tpu.reciprocal %250 {approx = true} : vector<8x1xf32> -> vector<8x1xf32>
    %252 = vector.broadcast %251 : vector<8x1xf32> to vector<8x8xf32>
    %253 = arith.mulf %248, %252 : vector<8x8xf32>
    %cst_81 = arith.constant dense<0.000000e+00> : vector<8x16xf32>
    %254 = tpu.matmul %253, %238, %cst_81 {dimension_numbers = #tpu.dot_dimension_numbers<[1], [0], [0], [1], [0, 0, 1, 1], [], []>} : vector<8x8xf32>, vector<8x16xf32>, vector<8x16xf32> -> vector<8x16xf32>
    %255 = tpu.concatenate %235, %254 in 1 : vector<8x16xf32>, vector<8x16xf32> -> vector<8x32xf32>
    %256 = vector.extract_strided_slice %216 {offsets = [8, 0], sizes = [8, 16], strides = [1, 1]} : vector<16x96xf32> to vector<8x16xf32>
    %257 = vector.extract_strided_slice %216 {offsets = [8, 32], sizes = [8, 16], strides = [1, 1]} : vector<16x96xf32> to vector<8x16xf32>
    %258 = vector.extract_strided_slice %216 {offsets = [8, 64], sizes = [8, 16], strides = [1, 1]} : vector<16x96xf32> to vector<8x16xf32>
    %cst_82 = arith.constant dense<0.000000e+00> : vector<8x8xf32>
    %259 = tpu.matmul %256, %257, %cst_82 {dimension_numbers = #tpu.dot_dimension_numbers<[1], [1], [0], [0], [0, 0, 1, 0], [], []>} : vector<8x16xf32>, vector<8x16xf32>, vector<8x8xf32> -> vector<8x8xf32>
    %cst_83 = arith.constant 2.500000e-01 : f32
    %260 = vector.broadcast %cst_83 : f32 to vector<8x8xf32>
    %261 = arith.mulf %259, %260 : vector<8x8xf32>
    %262 = vector.broadcast %53 : vector<1x8xf32> to vector<8x8xf32>
    %263 = arith.addf %261, %262 : vector<8x8xf32>
    %cst_84 = arith.constant dense<0xFF800000> : vector<8xf32>
    %264 = vector.multi_reduction <maximumf>, %263, %cst_84 [1] : vector<8x8xf32> to vector<8xf32>
    %265 = vector.shape_cast %264 : vector<8xf32> to vector<8x1xf32>
    %266 = vector.broadcast %265 : vector<8x1xf32> to vector<8x8xf32>
    %267 = arith.subf %263, %266 : vector<8x8xf32>
    %268 = math.exp %267 : vector<8x8xf32>
    %cst_85 = arith.constant dense<0.000000e+00> : vector<8xf32>
    %269 = vector.multi_reduction <add>, %268, %cst_85 [1] : vector<8x8xf32> to vector<8xf32>
    %270 = vector.shape_cast %269 : vector<8xf32> to vector<8x1xf32>
    %271 = tpu.reciprocal %270 {approx = true} : vector<8x1xf32> -> vector<8x1xf32>
    %272 = vector.broadcast %271 : vector<8x1xf32> to vector<8x8xf32>
    %273 = arith.mulf %268, %272 : vector<8x8xf32>
    %cst_86 = arith.constant dense<0.000000e+00> : vector<8x16xf32>
    %274 = tpu.matmul %273, %258, %cst_86 {dimension_numbers = #tpu.dot_dimension_numbers<[1], [0], [0], [1], [0, 0, 1, 1], [], []>} : vector<8x8xf32>, vector<8x16xf32>, vector<8x16xf32> -> vector<8x16xf32>
    %275 = vector.extract_strided_slice %216 {offsets = [8, 16], sizes = [8, 16], strides = [1, 1]} : vector<16x96xf32> to vector<8x16xf32>
    %276 = vector.extract_strided_slice %216 {offsets = [8, 48], sizes = [8, 16], strides = [1, 1]} : vector<16x96xf32> to vector<8x16xf32>
    %277 = vector.extract_strided_slice %216 {offsets = [8, 80], sizes = [8, 16], strides = [1, 1]} : vector<16x96xf32> to vector<8x16xf32>
    %cst_87 = arith.constant dense<0.000000e+00> : vector<8x8xf32>
    %278 = tpu.matmul %275, %276, %cst_87 {dimension_numbers = #tpu.dot_dimension_numbers<[1], [1], [0], [0], [0, 0, 1, 0], [], []>} : vector<8x16xf32>, vector<8x16xf32>, vector<8x8xf32> -> vector<8x8xf32>
    %cst_88 = arith.constant 2.500000e-01 : f32
    %279 = vector.broadcast %cst_88 : f32 to vector<8x8xf32>
    %280 = arith.mulf %278, %279 : vector<8x8xf32>
    %281 = vector.broadcast %53 : vector<1x8xf32> to vector<8x8xf32>
    %282 = arith.addf %280, %281 : vector<8x8xf32>
    %cst_89 = arith.constant dense<0xFF800000> : vector<8xf32>
    %283 = vector.multi_reduction <maximumf>, %282, %cst_89 [1] : vector<8x8xf32> to vector<8xf32>
    %284 = vector.shape_cast %283 : vector<8xf32> to vector<8x1xf32>
    %285 = vector.broadcast %284 : vector<8x1xf32> to vector<8x8xf32>
    %286 = arith.subf %282, %285 : vector<8x8xf32>
    %287 = math.exp %286 : vector<8x8xf32>
    %cst_90 = arith.constant dense<0.000000e+00> : vector<8xf32>
    %288 = vector.multi_reduction <add>, %287, %cst_90 [1] : vector<8x8xf32> to vector<8xf32>
    %289 = vector.shape_cast %288 : vector<8xf32> to vector<8x1xf32>
    %290 = tpu.reciprocal %289 {approx = true} : vector<8x1xf32> -> vector<8x1xf32>
    %291 = vector.broadcast %290 : vector<8x1xf32> to vector<8x8xf32>
    %292 = arith.mulf %287, %291 : vector<8x8xf32>
    %cst_91 = arith.constant dense<0.000000e+00> : vector<8x16xf32>
    %293 = tpu.matmul %292, %277, %cst_91 {dimension_numbers = #tpu.dot_dimension_numbers<[1], [0], [0], [1], [0, 0, 1, 1], [], []>} : vector<8x8xf32>, vector<8x16xf32>, vector<8x16xf32> -> vector<8x16xf32>
    %294 = tpu.concatenate %274, %293 in 1 : vector<8x16xf32>, vector<8x16xf32> -> vector<8x32xf32>
    %295 = tpu.concatenate %255, %294 in 0 : vector<8x32xf32>, vector<8x32xf32> -> vector<16x32xf32>
    %c72 = arith.constant 72 : index
    %c96_92 = arith.constant 96 : index
    %296 = vector.load %arg3[%c72, %c96_92] : memref<352x128xf32, #tpu.memory_space<vmem>>, vector<32x32xf32>
    %cst_93 = arith.constant dense<0.000000e+00> : vector<16x32xf32>
    %297 = tpu.matmul %295, %296, %cst_93 {dimension_numbers = #tpu.dot_dimension_numbers<[1], [0], [0], [1], [0, 0, 1, 1], [], []>} : vector<16x32xf32>, vector<32x32xf32>, vector<16x32xf32> -> vector<16x32xf32>
    %c104 = arith.constant 104 : index
    %c96_94 = arith.constant 96 : index
    %298 = vector.load %arg3[%c104, %c96_94] : memref<352x128xf32, #tpu.memory_space<vmem>>, vector<1x32xf32>
    %299 = vector.broadcast %298 : vector<1x32xf32> to vector<16x32xf32>
    %300 = arith.addf %297, %299 : vector<16x32xf32>
    %301 = arith.addf %211, %300 : vector<16x32xf32>
    %c112 = arith.constant 112 : index
    %c96_95 = arith.constant 96 : index
    %302 = vector.load %arg3[%c112, %c96_95] : memref<352x128xf32, #tpu.memory_space<vmem>>, vector<1x32xf32>
    %c120 = arith.constant 120 : index
    %c96_96 = arith.constant 96 : index
    %303 = vector.load %arg3[%c120, %c96_96] : memref<352x128xf32, #tpu.memory_space<vmem>>, vector<1x32xf32>
    %cst_97 = arith.constant dense<0.000000e+00> : vector<16xf32>
    %304 = vector.multi_reduction <add>, %301, %cst_97 [1] : vector<16x32xf32> to vector<16xf32>
    %305 = vector.shape_cast %304 : vector<16xf32> to vector<16x1xf32>
    %cst_98 = arith.constant 3.200000e+01 : f32
    %306 = vector.broadcast %cst_98 : f32 to vector<16x1xf32>
    %307 = arith.divf %305, %306 : vector<16x1xf32>
    %308 = vector.broadcast %307 : vector<16x1xf32> to vector<16x32xf32>
    %309 = arith.subf %301, %308 : vector<16x32xf32>
    %310 = arith.mulf %309, %309 : vector<16x32xf32>
    %cst_99 = arith.constant dense<0.000000e+00> : vector<16xf32>
    %311 = vector.multi_reduction <add>, %310, %cst_99 [1] : vector<16x32xf32> to vector<16xf32>
    %312 = vector.shape_cast %311 : vector<16xf32> to vector<16x1xf32>
    %cst_100 = arith.constant 3.200000e+01 : f32
    %313 = vector.broadcast %cst_100 : f32 to vector<16x1xf32>
    %314 = arith.divf %312, %313 : vector<16x1xf32>
    %cst_101 = arith.constant 9.99999996E-13 : f32
    %315 = vector.broadcast %cst_101 : f32 to vector<16x1xf32>
    %316 = arith.addf %314, %315 : vector<16x1xf32>
    %317 = math.rsqrt %316 : vector<16x1xf32>
    %318 = vector.broadcast %317 : vector<16x1xf32> to vector<16x32xf32>
    %319 = arith.mulf %309, %318 : vector<16x32xf32>
    %320 = vector.broadcast %302 : vector<1x32xf32> to vector<16x32xf32>
    %321 = arith.mulf %319, %320 : vector<16x32xf32>
    %322 = vector.broadcast %303 : vector<1x32xf32> to vector<16x32xf32>
    %323 = arith.addf %321, %322 : vector<16x32xf32>
    %c280 = arith.constant 280 : index
    %c0_102 = arith.constant 0 : index
    %324 = vector.load %arg3[%c280, %c0_102] : memref<352x128xf32, #tpu.memory_space<vmem>>, vector<32x64xf32>
    %cst_103 = arith.constant dense<0.000000e+00> : vector<16x64xf32>
    %325 = tpu.matmul %323, %324, %cst_103 {dimension_numbers = #tpu.dot_dimension_numbers<[1], [0], [0], [1], [0, 0, 1, 1], [], []>} : vector<16x32xf32>, vector<32x64xf32>, vector<16x64xf32> -> vector<16x64xf32>
    %c312 = arith.constant 312 : index
    %c0_104 = arith.constant 0 : index
    %326 = vector.load %arg3[%c312, %c0_104] : memref<352x128xf32, #tpu.memory_space<vmem>>, vector<1x64xf32>
    %327 = vector.broadcast %326 : vector<1x64xf32> to vector<16x64xf32>
    %328 = arith.addf %325, %327 : vector<16x64xf32>
    %cst_105 = arith.constant 5.000000e-01 : f32
    %329 = vector.broadcast %cst_105 : f32 to vector<16x64xf32>
    %330 = arith.mulf %329, %328 : vector<16x64xf32>
    %cst_106 = arith.constant 4.471500e-02 : f32
    %331 = vector.broadcast %cst_106 : f32 to vector<16x64xf32>
    %332 = arith.mulf %331, %328 : vector<16x64xf32>
    %333 = arith.mulf %332, %328 : vector<16x64xf32>
    %334 = arith.mulf %333, %328 : vector<16x64xf32>
    %335 = arith.addf %328, %334 : vector<16x64xf32>
    %cst_107 = arith.constant 0.797884583 : f32
    %336 = vector.broadcast %cst_107 : f32 to vector<16x64xf32>
    %337 = arith.mulf %336, %335 : vector<16x64xf32>
    %338 = math.tanh %337 : vector<16x64xf32>
    %cst_108 = arith.constant 1.000000e+00 : f32
    %339 = vector.broadcast %cst_108 : f32 to vector<16x64xf32>
    %340 = arith.addf %339, %338 : vector<16x64xf32>
    %341 = arith.mulf %330, %340 : vector<16x64xf32>
    %c280_109 = arith.constant 280 : index
    %c64_110 = arith.constant 64 : index
    %342 = vector.load %arg3[%c280_109, %c64_110] : memref<352x128xf32, #tpu.memory_space<vmem>>, vector<64x32xf32>
    %cst_111 = arith.constant dense<0.000000e+00> : vector<16x32xf32>
    %343 = tpu.matmul %341, %342, %cst_111 {dimension_numbers = #tpu.dot_dimension_numbers<[1], [0], [0], [1], [0, 0, 1, 1], [], []>} : vector<16x64xf32>, vector<64x32xf32>, vector<16x32xf32> -> vector<16x32xf32>
    %c344 = arith.constant 344 : index
    %c64_112 = arith.constant 64 : index
    %344 = vector.load %arg3[%c344, %c64_112] : memref<352x128xf32, #tpu.memory_space<vmem>>, vector<1x32xf32>
    %345 = vector.broadcast %344 : vector<1x32xf32> to vector<16x32xf32>
    %346 = arith.addf %343, %345 : vector<16x32xf32>
    %347 = arith.addf %323, %346 : vector<16x32xf32>
    %c128_113 = arith.constant 128 : index
    %c96_114 = arith.constant 96 : index
    %348 = vector.load %arg3[%c128_113, %c96_114] : memref<352x128xf32, #tpu.memory_space<vmem>>, vector<1x32xf32>
    %c136 = arith.constant 136 : index
    %c96_115 = arith.constant 96 : index
    %349 = vector.load %arg3[%c136, %c96_115] : memref<352x128xf32, #tpu.memory_space<vmem>>, vector<1x32xf32>
    %cst_116 = arith.constant dense<0.000000e+00> : vector<16xf32>
    %350 = vector.multi_reduction <add>, %347, %cst_116 [1] : vector<16x32xf32> to vector<16xf32>
    %351 = vector.shape_cast %350 : vector<16xf32> to vector<16x1xf32>
    %cst_117 = arith.constant 3.200000e+01 : f32
    %352 = vector.broadcast %cst_117 : f32 to vector<16x1xf32>
    %353 = arith.divf %351, %352 : vector<16x1xf32>
    %354 = vector.broadcast %353 : vector<16x1xf32> to vector<16x32xf32>
    %355 = arith.subf %347, %354 : vector<16x32xf32>
    %356 = arith.mulf %355, %355 : vector<16x32xf32>
    %cst_118 = arith.constant dense<0.000000e+00> : vector<16xf32>
    %357 = vector.multi_reduction <add>, %356, %cst_118 [1] : vector<16x32xf32> to vector<16xf32>
    %358 = vector.shape_cast %357 : vector<16xf32> to vector<16x1xf32>
    %cst_119 = arith.constant 3.200000e+01 : f32
    %359 = vector.broadcast %cst_119 : f32 to vector<16x1xf32>
    %360 = arith.divf %358, %359 : vector<16x1xf32>
    %cst_120 = arith.constant 9.99999996E-13 : f32
    %361 = vector.broadcast %cst_120 : f32 to vector<16x1xf32>
    %362 = arith.addf %360, %361 : vector<16x1xf32>
    %363 = math.rsqrt %362 : vector<16x1xf32>
    %364 = vector.broadcast %363 : vector<16x1xf32> to vector<16x32xf32>
    %365 = arith.mulf %355, %364 : vector<16x32xf32>
    %366 = vector.broadcast %348 : vector<1x32xf32> to vector<16x32xf32>
    %367 = arith.mulf %365, %366 : vector<16x32xf32>
    %368 = vector.broadcast %349 : vector<1x32xf32> to vector<16x32xf32>
    %369 = arith.addf %367, %368 : vector<16x32xf32>
    %370 = vector.extract_strided_slice %369 {offsets = [0, 0], sizes = [1, 32], strides = [1, 1]} : vector<16x32xf32> to vector<1x32xf32>
    %371 = vector.extract_strided_slice %369 {offsets = [8, 0], sizes = [1, 32], strides = [1, 1]} : vector<16x32xf32> to vector<1x32xf32>
    %372 = tpu.concatenate %370, %371 in 0 : vector<1x32xf32>, vector<1x32xf32> -> vector<2x32xf32>
    %c40_121 = arith.constant 40 : index
    %c32_122 = arith.constant 32 : index
    %373 = vector.load %arg3[%c40_121, %c32_122] : memref<352x128xf32, #tpu.memory_space<vmem>>, vector<32x32xf32>
    %cst_123 = arith.constant dense<0.000000e+00> : vector<2x32xf32>
    %374 = tpu.matmul %372, %373, %cst_123 {dimension_numbers = #tpu.dot_dimension_numbers<[1], [0], [0], [1], [0, 0, 1, 1], [], []>} : vector<2x32xf32>, vector<32x32xf32>, vector<2x32xf32> -> vector<2x32xf32>
    %c72_124 = arith.constant 72 : index
    %c32_125 = arith.constant 32 : index
    %375 = vector.load %arg3[%c72_124, %c32_125] : memref<352x128xf32, #tpu.memory_space<vmem>>, vector<1x32xf32>
    %376 = vector.broadcast %375 : vector<1x32xf32> to vector<2x32xf32>
    %377 = arith.addf %374, %376 : vector<2x32xf32>
    %378 = math.tanh %377 : vector<2x32xf32>
    %c0_126 = arith.constant 0 : index
    %c64_127 = arith.constant 64 : index
    %379 = vector.load %arg3[%c0_126, %c64_127] : memref<352x128xf32, #tpu.memory_space<vmem>>, vector<32x32xf32>
    %cst_128 = arith.constant dense<0.000000e+00> : vector<2x32xf32>
    %380 = tpu.matmul %378, %379, %cst_128 {dimension_numbers = #tpu.dot_dimension_numbers<[1], [0], [0], [1], [0, 0, 1, 1], [], []>} : vector<2x32xf32>, vector<32x32xf32>, vector<2x32xf32> -> vector<2x32xf32>
    %c32_129 = arith.constant 32 : index
    %c64_130 = arith.constant 64 : index
    %381 = vector.load %arg3[%c32_129, %c64_130] : memref<352x128xf32, #tpu.memory_space<vmem>>, vector<1x32xf32>
    %382 = vector.broadcast %381 : vector<1x32xf32> to vector<2x32xf32>
    %383 = arith.addf %380, %382 : vector<2x32xf32>
    %cst_131 = arith.constant 0.000000e+00 : f32
    %384 = vector.broadcast %cst_131 : f32 to vector<2x32xf32>
    %385 = arith.maximumf %383, %384 : vector<2x32xf32>
    %c40_132 = arith.constant 40 : index
    %c64_133 = arith.constant 64 : index
    %386 = vector.load %arg3[%c40_132, %c64_133] : memref<352x128xf32, #tpu.memory_space<vmem>>, vector<32x32xf32>
    %cst_134 = arith.constant dense<0.000000e+00> : vector<2x32xf32>
    %387 = tpu.matmul %385, %386, %cst_134 {dimension_numbers = #tpu.dot_dimension_numbers<[1], [0], [0], [1], [0, 0, 1, 1], [], []>} : vector<2x32xf32>, vector<32x32xf32>, vector<2x32xf32> -> vector<2x32xf32>
    %c72_135 = arith.constant 72 : index
    %c64_136 = arith.constant 64 : index
    %388 = vector.load %arg3[%c72_135, %c64_136] : memref<352x128xf32, #tpu.memory_space<vmem>>, vector<1x32xf32>
    %389 = vector.broadcast %388 : vector<1x32xf32> to vector<2x32xf32>
    %390 = arith.addf %387, %389 : vector<2x32xf32>
    %391 = vector.extract_strided_slice %390 {offsets = [0, 0], sizes = [2, 2], strides = [1, 1]} : vector<2x32xf32> to vector<2x2xf32>
    %c0_137 = arith.constant 0 : index
    %c0_138 = arith.constant 0 : index
    %392 = vector.load %arg4[%c0_137, %c0_138] : memref<2x2xf32, #tpu.memory_space<vmem>>, vector<2x2xf32>
    tpu.vector_store %arg4[%c0_137, %c0_138], %391 {strides = array<i32>} : memref<2x2xf32, #tpu.memory_space<vmem>>, vector<2x2xf32>,
    return
  }
  func.func @transform_0(%arg0: i32) -> (i32, i32) {
    %c0_i32 = arith.constant 0 : i32
    %c0_i32_0 = arith.constant 0 : i32
    %c0_i32_1 = arith.constant 0 : i32
    return %c0_i32, %c0_i32_0 : i32, i32
  }
  func.func @transform_1(%arg0: i32) -> (i32, i32) {
    %c0_i32 = arith.constant 0 : i32
    %c0_i32_0 = arith.constant 0 : i32
    %c0_i32_1 = arith.constant 0 : i32
    return %c0_i32, %c0_i32_0 : i32, i32
  }
  func.func @transform_2(%arg0: i32) -> (i32, i32) {
    %c0_i32 = arith.constant 0 : i32
    %c0_i32_0 = arith.constant 0 : i32
    %c0_i32_1 = arith.constant 0 : i32
    return %c0_i32, %c0_i32_0 : i32, i32
  }
  func.func @transform_3(%arg0: i32) -> (i32, i32) {
    %c0_i32 = arith.constant 0 : i32
    %c0_i32_0 = arith.constant 0 : i32
    %c0_i32_1 = arith.constant 0 : i32
    return %c0_i32, %c0_i32_0 : i32, i32
  }
}

</mosaic_0001>

<bundles_post_ra>
// kernel: bert_sentiment_forward.1
= control target key start
LH: loop header
LB: loop body
LE: loop exit
PB: predicated region body
PF: predicated region fallthrough
CT: control target
= control target key end

     0   :  { %8 = vsyncpa [#allocation3], 0  ;;  %s4151_s0 = inlined_call_operand.vmem [shape: s32[16,2], index: 0, kind: input, shape index: {}]   ;;  %s4152_s1 = inlined_call_operand.vmem [shape: s32[2,8], index: 1, kind: input, shape index: {}]   ;;  %s4153_s2 = inlined_call_operand.hbm [shape: f32[352,128], index: 2, kind: input, shape index: {}]   ;;  %s4154_s3 = inlined_call_operand.hbm [shape: f32[2,2], index: 3, kind: output, shape index: {}]  }
   0x1   :  { %9 = vsyncpa [#allocation4], 0  ;;  %s3765_s12 = smov [#allocation2]   ;;  %s3717_s16 = scalar_lea.hbm %s4153_s2, 5632 }
   0x2   :  { %s19_s13 = sshll.u32 %s3765_s12, 4  ;;  %p3718_p0 = scmp.ne.s32.totalorder %s4153_s2, %s3717_s16  ;;  %s20_s13 = int_to_ptr.vmem [resolvable:$true] %s19_s13 }
   0x3   :  { %p3721_p1 = scmp.lt.u32.totalorder %s3717_s16, %s4153_s2 }
   0x5   :  { %p3723_p2 = pnand %p3721_p1, %p3718_p0 }
   0x7   :  { %3726 = shalt.err (!%p3723_p2)
}
   0x8   :  { %s3727_s21 = scalar_lea.vmem %s20_s13, 5632  ;;  %p3732_p4 = scmp.lt.s32.totalorder %s20_s13, %s20_s13 }
   0x9   :  { %p3728_p3 = scmp.ne.s32.totalorder %s20_s13, %s3727_s21  ;;  %p3733_p5 = scmp.lt.s32.totalorder %s3727_s21, %s3727_s21 }
   0xb   :  { %p3734_p6 = por %p3733_p5, %p3732_p4 }
   0xd   :  { %p3735_p7 = pnand %p3734_p6, %p3728_p3 }
   0xf   :  { %3738 = shalt.err (!%p3735_p7)
}
  0x10   :  { %s3766_s22 = smov 128   ;;  %s3767_s23 = smov 8  }
  0x11   :  { %25 = dma.hbm_to_vmem [thread:$0]  %s4153_s2, 5632, %s20_s13, [#allocation3], %s3766_s22, %s3766_s22, %s3767_s23  }
  0x12   :  { %3761 = dma.done.wait [#allocation3], 5632  }
  0x13   :  { %3762 = vsyncadd [#allocation3], 4294961664  ;;  %v3768_v0 = vmov 0   ;;  %v3769_v1 = vmov 1   ;;  %v29_v2 = vld [vmem:[%s4151_s0] sm:$0xff]  ;;  %v3819_v5 = vld [vmem:[#allocation2 + $0x8] sm:$0xff]  ;;  %v33_v8 = vlaneseq }
  0x14   :  { %3561 = vset.pattern.permute.xlu0 %v3768_v0  ;;  %3562 = vset.pattern.permute.xlu1 %v3769_v1  ;;  %v3817_v3 = vld [vmem:[#allocation2] sm:$0xff]  ;;  %v31_v4 = vcvt.s32.f32 %v29_v2  ;;  %v3821_v6 = vld [vmem:[#allocation2 + $0x10] sm:$0xff]  ;;  %v3823_v7 = vld [vmem:[#allocation2 + $0x18] sm:$0xff]  ;;  %s3770_s30 = smov 96   ;;  %v3771_v46 = vmov 1.0   ;;  %vm189_vm2 = vcmask 261120  }
  0x15   :  { %36 = vperm.xlu0 %3561, %v29_v2   ;;  %v30_v9 = vld [vmem:[%s4151_s0 + $0x8] sm:$0xff]  ;;  %v3414_v10 = vpack.c.bf16 %v3819_v5, %v3817_v3  ;;  %v3418_v11 = vpack.c.bf16 %v3823_v7, %v3821_v6  ;;  %v52_v13 = vld [vmem:[#allocation2 + $0x20] sm:$0xff]  ;;  %v3832_v15 = vshrl.u32 %v33_v8, 7  ;;  %v47_v17 = vld [vmem:[#allocation2 + $0x10] sm:$0x3]  ;;  %v34_v44 = vand.u32 127, %v33_v8 }
  0x16   :  { %v32_v12 = vcvt.s32.f32 %v30_v9  ;;  %163 = vperm.xlu1 %3562, %v31_v4   ;;  %v53_v14 = vld [vmem:[#allocation2 + $0x28] sm:$0xff]  ;;  %v237_v18 = vld [vmem:[%s4152_s1] sm:$0x3]  ;;  %v54_v19 = vld [vmem:[#allocation2 + $0x30] sm:$0xff]  ;;  %v158_v21 = vrot.slane %v47_v17, 7  ;;  %vm3773_vm3 = vmmov 0  }
  0x17   :  { %3415 = vmatprep.subr.bf16.mxu0 %v3414_v10  ;;  %v3422_v16 = vpack.c.bf16 %v53_v14, %v52_v13  ;;  %v55_v20 = vld [vmem:[#allocation2 + $0x38] sm:$0xff]  ;;  %v173_v22 = vsub.s32 1, %v3832_v15  ;;  %v238_v23 = vcvt.s32.f32 %v237_v18  ;;  %v149_v24 = vsub.s32 0, %v3832_v15  ;;  %v56_v29 = vld [vmem:[#allocation2 + $0x40] sm:$0xff]  ;;  %v57_v30 = vld [vmem:[#allocation2 + $0x48] sm:$0xff]  ;;  %s3774_s1 = smov 64  }
  0x18   :  { %3417 = vmatpush3.bf16.msra.mxu0 %v3414_v10  ;;  %v160_v25 = vsub.f32 %v47_v17, %v158_v21  ;;  %v3426_v28 = vpack.c.bf16 %v55_v20, %v54_v19  ;;  %v3430_v34 = vpack.c.bf16 %v57_v30, %v56_v29  ;;  %v58_v35 = vld [vmem:[#allocation2 + $0x50] sm:$0xff]  ;;  %v59_v36 = vld [vmem:[#allocation2 + $0x58] sm:$0xff]  ;;  %v60_v38 = vld [vmem:[#allocation2 + $0x60] sm:$0xff]  ;;  %vm334_vm4 = vcmask 130048   ;;  %s3775_s4 = smov 112   ;;  %s3776_s5 = smov 80  }
  0x19   :  { %39 = vperm.xlu0 %3561, %v30_v9   ;;  %3419 = vmatprep.subr.bf16.mxu0 %v3418_v11  ;;  %v239_v26 = vsub.f32 1.0, %v238_v23  ;;  %v150_v27 = vrot.slane %v47_v17, %v149_v24  ;;  %v3434_v37 = vpack.c.bf16 %v59_v36, %v58_v35  ;;  %v61_v39 = vld [vmem:[#allocation2 + $0x68] sm:$0xff]  ;;  %v62_v41 = vld [vmem:[#allocation2 + $0x70] sm:$0xff]  ;;  %v63_v42 = vld [vmem:[#allocation2 + $0x78] sm:$0xff]  ;;  %vm415_vm5 = vcmask 64512   ;;  %s3777_s6 = smov 48  }
  0x1a   :  { %168 = vperm.xlu1 %3562, %v32_v12   ;;  %v174_v31 = vrot.slane %v160_v25, %v173_v22  ;;  %v3438_v40 = vpack.c.bf16 %v61_v39, %v60_v38  ;;  %v3442_v43 = vpack.c.bf16 %v63_v42, %v62_v41  ;;  %v3857_v18 = vld [vmem:[#allocation2 + $0x20] ss:$0 sm:$0xff]  ;;  %v242_v20 = vld [vmem:[#allocation2 + $0x88] sm:$0xff]  ;;  %v2980_v21 = vld [vmem:[#allocation2 + $0x18] ss:$0 sm:$0xff]  ;;  %s3778_s7 = smov 32  }
  0x1b   :  { %v3843_v32 = vmul.f32 -10000.0, %v239_v26  ;;  %v241_v19 = vld [vmem:[#allocation2 + $0x80] sm:$0xff]  ;;  %v243_v23 = vld [vmem:[#allocation2 + $0x90] sm:$0xff]  ;;  %v244_v25 = vld [vmem:[#allocation2 + $0x98] sm:$0xff]  ;;  %s3779_s8 = smov 16   ;;  %vm1328_vm6 = vcmask 523264  }
  0x1c   :  { %3421 = vmatpush3.bf16.msra.mxu0 %v3418_v11  ;;  %v3450_v26 = vpack.c.bf16 %v244_v25, %v243_v23  ;;  %vm2677_vm7 = vcmask 1040384   ;;  %s3781_s9 = smov [#allocation5]   ;;  %vm2959_vm8 = vcmask 9216  }
  0x1d   :  { %66 = vrot.lane.b32.xlu0 %v3817_v3, %s3770_s30  ;;  %3423 = vmatprep.subr.bf16.mxu0 %v3422_v16  ;;  %v3848_v33 = vrot.slane %v3843_v32, %v173_v22  ;;  %v3446_v22 = vpack.c.bf16 %v242_v20, %v241_v19  ;;  %s2967_s10 = sshll.u32 %s3781_s9, 4  ;;  %s2968_s10 = int_to_ptr.vmem [resolvable:$true] %s2967_s10 }
  0x1e   :  { %3653 = vset.pattern.permute.xlu0 %v3769_v1  ;;  %68 = vrot.lane.b32.xlu1 %v3819_v5, %s3770_s30  ;;  %s3739_s11 = scalar_lea.vmem %s2968_s10, 32  ;;  %p3744_p9 = scmp.lt.s32.totalorder %s2968_s10, %s2968_s10 }
  0x1f   :  { %3447 = vmatprep.subr.bf16.mxu1 %v3446_v22  ;;  %p3740_p8 = scmp.ne.s32.totalorder %s2968_s10, %s3739_s11  ;;  %p3745_p10 = scmp.lt.s32.totalorder %s3739_s11, %s3739_s11 }
  0x20   :  { %3425 = vmatpush3.bf16.msra.mxu0 %v3422_v16  ;;  %3449 = vmatpush3.bf16.msra.mxu1 %v3446_v22 }
  0x21   :  { %152 = vrot.lane.b32.xlu0 %v150_v27, %s3770_s30  ;;  %3427 = vmatprep.subr.bf16.mxu0 %v3426_v28  ;;  %p3746_p11 = por %p3745_p10, %p3744_p9 }
  0x22   :  { %3451 = vmatprep.subr.bf16.mxu1 %v3450_v26 }
  0x23   :  { %p3747_p12 = pnand %p3746_p11, %p3740_p8 }
  0x24   :  { %3429 = vmatpush3.bf16.msra.mxu0 %v3426_v28  ;;  %3453 = vmatpush3.bf16.msra.mxu1 %v3450_v26 }
  0x25   :  { %3431 = vmatprep.subr.bf16.mxu0 %v3430_v34 }
  0x28   :  { %3433 = vmatpush3.bf16.msra.mxu0 %v3430_v34 }
  0x29   :  { %3435 = vmatprep.subr.bf16.mxu0 %v3434_v37 }
  0x2c   :  { %3437 = vmatpush3.bf16.msra.mxu0 %v3434_v37 }
  0x2d   :  { %3439 = vmatprep.subr.bf16.mxu0 %v3438_v40 }
  0x30   :  { %3441 = vmatpush3.bf16.msra.mxu0 %v3438_v40 }
  0x31   :  { %3443 = vmatprep.subr.bf16.mxu0 %v3442_v43 }
  0x34   :  { %3445 = vmatpush3.bf16.msra.mxu0 %v3442_v43 }
  0x94   :  { %v37_v45 = vpop.permute.xlu0 %36 }
  0x95   :  { %vm41_vm0 = vcmp.eq.s32.totalorder %v37_v45, %v34_v44  ;;  %v164_v47 = vpop.permute.xlu1 %163  ;;  %v3772_v45 = vmov 0.0  }
  0x96   :  { %3194 = vmatprep.mubr.msk.f32.mxu0 %vm41_vm0, %v3771_v46  ;;  %v175_v48 = vmul.f32 %v174_v31, %v164_v47  ;;  %3208 = vmatprep.subr.mxu1 %v3772_v45 }
  0x98   :  { %v40_v49 = vpop.permute.xlu0 %39  ;;  %179 = vrot.lane.b32.xlu1 %v175_v48, %s3770_s30 }
  0x99   :  { %vm42_vm1 = vcmp.eq.s32.totalorder %v40_v49, %v34_v44  ;;  %v169_v50 = vpop.permute.xlu1 %168 }
  0x9a   :  { %3195 = vmatmul.mubr.msk.f32.vlgmr.msra.gmra.mrb[0].mxu0 %vm42_vm1, %v3771_v46  ;;  %v176_v51 = vmul.f32 %v174_v31, %v169_v50  ;;  %v2982_v46 = vld [vmem:[#allocation2 + $0xa0] ss:$0 sm:$0xff] }
  0x9c   :  { %181 = vrot.lane.b32.xlu0 %v176_v51, %s3770_s30  ;;  %v67_v52 = vpop.permute.xlu0 %66 }
  0x9d   :  { %v69_v54 = vpop.permute.xlu1 %68 }
  0xa0   :  { %v153_v53 = vpop.permute.xlu0 %152 }
 0x10a   :  { %v180_v63 = vpop.permute.xlu1 %179 }
 0x10e   :  { %v182_v60 = vpop.permute.xlu0 %181 }
 0x16d   :  { %v3196_v55 = vpop.f32.mrb[0].mxu0 }
 0x16e   :  { %v144_v56 = vadd.f32 %v3196_v55, %v69_v54  ;;  %v138_v57 = vpop.f32.mrb[1].mxu0 }
 0x16f   :  { %v139_v58 = vadd.f32 %v138_v57, %v67_v52  ;;  %v3884_v52 = vrot.slane %v3843_v32, %v149_v24 }
 0x170   :  { %v156_v59 = vadd.f32 %v153_v53, %v144_v56 }
 0x171   :  { %v155_v61 = vadd.f32 %v153_v53, %v139_v58 }
 0x172   :  { %v186_v62 = vadd.f32 %v182_v60, %v156_v59 }
 0x173   :  { %v185_v0 = vadd.f32 %v180_v63, %v155_v61 }
 0x174   :  { %v193_v1 = vsel %vm189_vm2, %v186_v62, 0.0 }
 0x175   :  { %194 = vadd.xlane.f32.xlu0 %v193_v1  ;;  %v190_v2 = vsel %vm189_vm2, %v185_v0, 0.0 }
 0x176   :  { %191 = vadd.xlane.f32.xlu1 %v190_v2 }
 0x202   :  { %v195_v4 = vpop.xlane.xlu0 %194 }
 0x203   :  { %v198_v8 = vmul.f32 0.03125, %v195_v4  ;;  %v192_v9 = vpop.xlane.xlu1 %191 }
 0x204   :  { %v197_v10 = vmul.f32 0.03125, %v192_v9 }
 0x205   :  { %v200_v11 = vsub.f32 %v186_v62, %v198_v8 }
 0x206   :  { %v199_v12 = vsub.f32 %v185_v0, %v197_v10 }
 0x207   :  { %v202_v13 = vmul.f32 %v200_v11, %v200_v11 }
 0x208   :  { %v201_v14 = vmul.f32 %v199_v12, %v199_v12 }
 0x209   :  { %v206_v16 = vsel %vm189_vm2, %v202_v13, 0.0 }
 0x20a   :  { %207 = vadd.xlane.f32.xlu1 %v206_v16  ;;  %v203_v17 = vsel %vm189_vm2, %v201_v14, 0.0 }
 0x20b   :  { %204 = vadd.xlane.f32.xlu0 %v203_v17 }
 0x21b   :  { %232 = vrot.lane.b32.xlu1 %v3857_v18, %s3770_s30 }
 0x221   :  { %222 = vrot.lane.b32.xlu0 %v2980_v21, %s3770_s30 }
 0x297   :  { %v208_v27 = vpop.xlane.xlu1 %207 }
 0x298   :  { %v210_v28 = vmul.f32 0.03125, %v208_v27  ;;  %v205_v29 = vpop.xlane.xlu0 %204 }
 0x299   :  { %v209_v30 = vmul.f32 0.03125, %v205_v29 }
 0x29a   :  { %v212_v31 = vadd.f32 1e-12, %v210_v28 }
 0x29b   :  { %v211_v34 = vadd.f32 1e-12, %v209_v30  ;;  %v233_v41 = vpop.permute.xlu1 %232 }
 0x29c   :  { %3654 = vrsqrt.f32 %v212_v31  ;;  %v223_v36 = vpop.permute.xlu0 %222 }
 0x29d   :  { %3656 = vrsqrt.f32 %v211_v34 }
 0x2a6   :  { %v3655_v35 = vpop.eup %3654 }
 0x2a7   :  { %v3657_v37 = vpop.eup %3656  ;;  %v216_v38 = vmul.f32 %v3655_v35, %v200_v11 }
 0x2a8   :  { %v215_v39 = vmul.f32 %v3657_v37, %v199_v12 }
 0x2a9   :  { %v226_v40 = vmul.f32 %v223_v36, %v216_v38 }
 0x2aa   :  { %v225_v42 = vmul.f32 %v223_v36, %v215_v39 }
 0x2ab   :  { %v3864_v44 = vadd.f32 %v233_v41, %v226_v40 }
 0x2ac   :  { %v3862_v43 = vadd.f32 %v233_v41, %v225_v42 }
 0x2ae   :  { %3205 = vmatprep.mubr.msk.f32.mxu1 %vm189_vm2, %v3862_v43 }
 0x2af   :  { %3206 = vmatmul.mubr.msk.f32.vlgmr.msra.gmra.mrb[0].mxu1 %vm189_vm2, %v3864_v44 }
 0x2b0   :  { %3210 = vmatprep.mubr.msk.f32.mxu1 %vm3773_vm3, %v3772_v45 }
 0x382   :  { %v3207_v47 = vpop.f32.mrb[0].mxu1 }
 0x383   :  { %v3873_v48 = vadd.f32 %v3207_v47, %v2982_v46  ;;  %v322_v49 = vpop.f32.mrb[1].mxu1 }
 0x384   :  { %v323_v50 = vadd.f32 %v2982_v46, %v322_v49 }
 0x386   :  { %332 = vrot.lane.b32.xlu1 %v323_v50, %s3770_s30 }
 0x3f8   :  { %v333_v51 = vpop.permute.xlu1 %332 }
 0x3f9   :  { %3209 = vmatpush3.xpose.msk.msra.mxu1 %vm334_vm4, %v333_v51 }
 0x3fa   :  { %3213 = vmatprep.subr.mxu1 %v3772_v45 }
 0x3fc   :  { %3211 = vmatmul.mubr.msk.f32.vlgmr.msra.gmra.mrb[2].mxu1 %vm334_vm4, %v323_v50 }
 0x3fd   :  { %3215 = vmatprep.mubr.msk.f32.mxu1 %vm3773_vm3, %v3772_v45 }
 0x4cf   :  { %v405_v53 = vpop.f32.mrb[2].mxu1 }
 0x4d0   :  { %v409_v54 = vmul.f32 0.25, %v405_v53  ;;  %v3212_v55 = vpop.f32.mrb[3].mxu1 }
 0x4d2   :  { %v414_v56 = vadd.f32 %v3884_v52, %v409_v54 }
 0x4d4   :  { %v416_v57 = vsel %vm415_vm5, %v414_v56, -inf }
 0x4d5   :  { %417 = vmax.xlane.f32.xlu0 %v416_v57 }
 0x4eb   :  { %427 = vrot.lane.b32.xlu0 %v323_v50, %s3774_s1 }
 0x4ef   :  { %503 = vrot.lane.b32.xlu0 %v323_v50, %s3775_s4 }
 0x562   :  { %v418_v58 = vpop.xlane.xlu0 %417 }
 0x563   :  { %v419_v15 = vsub.f32 %v414_v56, %v418_v58 }
 0x565   :  { %v420_v59 = vmul.f32 1.442695, %v419_v15 }
 0x566   :  { %v428_v24 = vpop.permute.xlu0 %427 }
 0x567   :  { %3658 = vpow2.f32 %v420_v59  ;;  %3214 = vmatpush3.msra.mxu1 %v428_v24 }
 0x568   :  { %3218 = vmatprep.subr.mxu1 %v3772_v45 }
 0x56a   :  { %v504_v1 = vpop.permute.xlu0 %503 }
 0x571   :  { %v3659_v32 = vpop.eup %3658 }
 0x572   :  { %v422_v60 = vsel %vm415_vm5, %v3659_v32, 0.0 }
 0x573   :  { %423 = vadd.xlane.f32.xlu1 %v422_v60 }
 0x584   :  { %505 = vrot.lane.b32.xlu1 %v323_v50, %s3776_s5 }
 0x600   :  { %v424_v61 = vpop.xlane.xlu1 %423 }
 0x601   :  { %3660 = vrcp.f32 %v424_v61  ;;  %v3944_v61 = vpack.i.bf16 %v3819_v5, %v3817_v3 }
 0x604   :  { %v506_v0 = vpop.permute.xlu1 %505 }
 0x60b   :  { %v3661_v62 = vpop.eup %3660 }
 0x60c   :  { %v426_v63 = vmul.f32 %v3661_v62, %v3659_v32 }
 0x60e   :  { %3216 = vmatmul.mubr.msk.f32.vlgmr.msra.gmra.mrb[4].mxu1 %vm415_vm5, %v426_v63 }
 0x60f   :  { %3219 = vmatpush3.xpose.msk.msra.mxu1 %vm334_vm4, %v506_v0  ;;  %3220 = vmatprep.mubr.msk.f32.mxu1 %vm3773_vm3, %v3772_v45 }
 0x610   :  { %3223 = vmatprep.subr.mxu1 %v3772_v45 }
 0x612   :  { %3221 = vmatmul.mubr.msk.f32.vlgmr.msra.gmra.mrb[6].mxu1 %vm334_vm4, %v504_v1 }
 0x613   :  { %3225 = vmatprep.mubr.msk.f32.mxu1 %vm3773_vm3, %v3772_v45 }
 0x6e1   :  { %v3901_v2 = vpop.f32.mrb[4].mxu1 }
 0x6e2   :  { %v3217_v4 = vpop.f32.mrb[5].mxu1 }
 0x6e5   :  { %v577_v8 = vpop.f32.mrb[6].mxu1 }
 0x6e6   :  { %v581_v9 = vmul.f32 0.25, %v577_v8  ;;  %v3222_v10 = vpop.f32.mrb[7].mxu1 }
 0x6e8   :  { %v582_v11 = vadd.f32 %v581_v9, %v3884_v52 }
 0x6ea   :  { %v583_v12 = vsel %vm415_vm5, %v582_v11, -inf }
 0x6eb   :  { %584 = vmax.xlane.f32.xlu1 %v583_v12 }
 0x6fc   :  { %676 = vrot.lane.b32.xlu1 %v3873_v48, %s3770_s30 }
 0x778   :  { %v585_v13 = vpop.xlane.xlu1 %584 }
 0x779   :  { %v586_v14 = vsub.f32 %v582_v11, %v585_v13 }
 0x77b   :  { %v587_v16 = vmul.f32 1.442695, %v586_v14 }
 0x77c   :  { %v677_v25 = vpop.permute.xlu1 %676 }
 0x77d   :  { %3662 = vpow2.f32 %v587_v16 }
 0x787   :  { %v3663_v17 = vpop.eup %3662 }
 0x788   :  { %v589_v19 = vsel %vm415_vm5, %v3663_v17, 0.0 }
 0x789   :  { %590 = vadd.xlane.f32.xlu0 %v589_v19 }
 0x79f   :  { %594 = vrot.lane.b32.xlu0 %v323_v50, %s3777_s6 }
 0x816   :  { %v591_v20 = vpop.xlane.xlu0 %590 }
 0x817   :  { %3664 = vrcp.f32 %v591_v20 }
 0x81a   :  { %v595_v21 = vpop.permute.xlu0 %594 }
 0x81b   :  { %3224 = vmatpush3.msra.mxu1 %v595_v21 }
 0x81c   :  { %3228 = vmatprep.subr.mxu1 %v3772_v45 }
 0x821   :  { %v3665_v22 = vpop.eup %3664 }
 0x822   :  { %v593_v23 = vmul.f32 %v3665_v22, %v3663_v17 }
 0x824   :  { %3226 = vmatmul.mubr.msk.f32.vlgmr.msra.gmra.mrb[8].mxu1 %vm415_vm5, %v593_v23 }
 0x825   :  { %3229 = vmatpush3.xpose.msk.msra.mxu1 %vm334_vm4, %v677_v25  ;;  %3230 = vmatprep.mubr.msk.f32.mxu1 %vm3773_vm3, %v3772_v45 }
 0x826   :  { %3233 = vmatprep.subr.mxu1 %v3772_v45 }
 0x828   :  { %3231 = vmatmul.mubr.msk.f32.vlgmr.msra.gmra.mrb[10].mxu1 %vm334_vm4, %v3873_v48 }
 0x829   :  { %3235 = vmatprep.mubr.msk.f32.mxu1 %vm3773_vm3, %v3772_v45 }
 0x8f7   :  { %v666_v26 = vpop.f32.mrb[8].mxu1 }
 0x8f8   :  { %v3227_v27 = vpop.f32.mrb[9].mxu1 }
 0x8fb   :  { %v748_v28 = vpop.f32.mrb[10].mxu1 }
 0x8fc   :  { %v752_v29 = vmul.f32 0.25, %v748_v28  ;;  %v3232_v30 = vpop.f32.mrb[11].mxu1 }
 0x8fe   :  { %v757_v31 = vadd.f32 %v3848_v33, %v752_v29 }
 0x900   :  { %v758_v34 = vsel %vm415_vm5, %v757_v31, -inf }
 0x901   :  { %759 = vmax.xlane.f32.xlu1 %v758_v34 }
 0x912   :  { %847 = vrot.lane.b32.xlu1 %v3873_v48, %s3776_s5 }
 0x916   :  { %845 = vrot.lane.b32.xlu1 %v3873_v48, %s3775_s4 }
 0x98e   :  { %v760_v35 = vpop.xlane.xlu1 %759 }
 0x98f   :  { %v761_v36 = vsub.f32 %v757_v31, %v760_v35 }
 0x991   :  { %v762_v37 = vmul.f32 1.442695, %v761_v36 }
 0x992   :  { %v848_v46 = vpop.permute.xlu1 %847 }
 0x993   :  { %3666 = vpow2.f32 %v762_v37  ;;  %v3000_v37 = vld [vmem:[#allocation2 + $0x30] ss:$0 sm:$0xff] }
 0x996   :  { %v846_v49 = vpop.permute.xlu1 %845 }
 0x99d   :  { %v3667_v38 = vpop.eup %3666 }
 0x99e   :  { %v764_v39 = vsel %vm415_vm5, %v3667_v38, 0.0 }
 0x99f   :  { %765 = vadd.xlane.f32.xlu0 %v764_v39  ;;  %v1172_v39 = vld [vmem:[#allocation2 + $0xb0] sm:$0xff] }
 0x9b5   :  { %769 = vrot.lane.b32.xlu0 %v3873_v48, %s3774_s1 }
 0xa2c   :  { %v766_v40 = vpop.xlane.xlu0 %765 }
 0xa2d   :  { %3668 = vrcp.f32 %v766_v40 }
 0xa30   :  { %v770_v41 = vpop.permute.xlu0 %769 }
 0xa31   :  { %3234 = vmatpush3.msra.mxu1 %v770_v41  ;;  %v1173_v41 = vld [vmem:[#allocation2 + $0xb8] sm:$0xff] }
 0xa32   :  { %3238 = vmatprep.subr.mxu1 %v3772_v45 }
 0xa37   :  { %v3669_v42 = vpop.eup %3668 }
 0xa38   :  { %v768_v47 = vmul.f32 %v3669_v42, %v3667_v38  ;;  %v1171_v38 = vld [vmem:[#allocation2 + $0xa8] sm:$0xff]  ;;  %v1174_v42 = vld [vmem:[#allocation2 + $0xc0] sm:$0xff] }
 0xa39   :  { %v3462_v40 = vpack.c.bf16 %v1172_v39, %v1171_v38 }
 0xa3a   :  { %3236 = vmatmul.mubr.msk.f32.vlgmr.msra.gmra.mrb[12].mxu1 %vm415_vm5, %v768_v47  ;;  %v3573_v47 = vpack.i.bf16 %v1172_v39, %v1171_v38 }
 0xa3b   :  { %3239 = vmatpush3.xpose.msk.msra.mxu1 %vm334_vm4, %v848_v46  ;;  %3240 = vmatprep.mubr.msk.f32.mxu1 %vm3773_vm3, %v3772_v45  ;;  %v3466_v46 = vpack.c.bf16 %v1174_v42, %v1173_v41 }
 0xa3c   :  { %3243 = vmatprep.subr.mxu1 %v3772_v45 }
 0xa3e   :  { %3241 = vmatmul.mubr.msk.f32.vlgmr.msra.gmra.mrb[14].mxu1 %vm334_vm4, %v846_v49  ;;  %v1283_v49 = vld [vmem:[#allocation2 + $0xc8] sm:$0xff] }
 0xa3f   :  { %3245 = vmatprep.mubr.msk.f32.mxu1 %vm3773_vm3, %v3772_v45 }
 0xb0d   :  { %v841_v50 = vpop.f32.mrb[12].mxu1 }
 0xb0e   :  { %v3237_v51 = vpop.f32.mrb[13].mxu1 }
 0xb11   :  { %v919_v53 = vpop.f32.mrb[14].mxu1 }
 0xb12   :  { %v923_v54 = vmul.f32 0.25, %v919_v53  ;;  %v3242_v55 = vpop.f32.mrb[15].mxu1  ;;  %v3578_v53 = vpack.i.bf16 %v1174_v42, %v1173_v41 }
 0xb13   :  { %v1286_v55 = vld [vmem:[#allocation2 + $0xe0] sm:$0xff] }
 0xb14   :  { %v924_v56 = vadd.f32 %v923_v54, %v3848_v33  ;;  %v1285_v54 = vld [vmem:[#allocation2 + $0xd8] sm:$0xff] }
 0xb16   :  { %v925_v57 = vsel %vm415_vm5, %v924_v56, -inf }
 0xb17   :  { %926 = vmax.xlane.f32.xlu0 %v925_v57 }
 0xb2d   :  { %936 = vrot.lane.b32.xlu0 %v3873_v48, %s3777_s6  ;;  %v3953_v48 = vpack.i.bf16 %v3823_v7, %v3821_v6 }
 0xb31   :  { %3569 = vrot.lane.b32.xlu0 %v3953_v48, %s3778_s7 }
 0xba4   :  { %v927_v58 = vpop.xlane.xlu0 %926 }
 0xba5   :  { %v928_v15 = vsub.f32 %v924_v56, %v927_v58  ;;  %v3588_v56 = vpack.i.bf16 %v1286_v55, %v1285_v54 }
 0xba7   :  { %v929_v59 = vmul.f32 1.442695, %v928_v15 }
 0xba8   :  { %v937_v24 = vpop.permute.xlu0 %936 }
 0xba9   :  { %3670 = vpow2.f32 %v929_v59  ;;  %3244 = vmatpush3.msra.mxu1 %v937_v24 }
 0xbaa   :  { %3463 = vmatprep.subr.bf16.mxu1 %v3462_v40 }
 0xbac   :  { %v3570_v7 = vpop.permute.xlu0 %3569 }
 0xbad   :  { %v3572_v8 = vunpack.i.h.bf16 %v3570_v7  ;;  %v3571_v9 = vunpack.i.l.bf16 %v3570_v7 }
 0xbaf   :  { %v3458_v10 = vpack.c.bf16 %v3572_v8, %v3571_v9 }
 0xbb3   :  { %v3671_v32 = vpop.eup %3670 }
 0xbb4   :  { %v931_v60 = vsel %vm415_vm5, %v3671_v32, 0.0 }
 0xbb5   :  { %932 = vadd.xlane.f32.xlu1 %v931_v60 }
 0xbc6   :  { %3564 = vrot.lane.b32.xlu1 %v3944_v61, %s3778_s7 }
 0xbca   :  { %671 = vrot.lane.b32.xlu1 %v666_v26, %s3779_s8  ;;  %v2999_v26 = vld [vmem:[#allocation2 + $0x28] ss:$0 sm:$0xff] }
 0xbce   :  { %1037 = vrot.lane.b32.xlu1 %v3857_v18, %s3778_s7 }
 0xc42   :  { %v933_v62 = vpop.xlane.xlu1 %932 }
 0xc43   :  { %3672 = vrcp.f32 %v933_v62 }
 0xc46   :  { %v3565_v3 = vpop.permute.xlu1 %3564 }
 0xc47   :  { %v3567_v5 = vunpack.i.h.bf16 %v3565_v3  ;;  %v3566_v63 = vunpack.i.l.bf16 %v3565_v3 }
 0xc49   :  { %v3454_v0 = vpack.c.bf16 %v3567_v5, %v3566_v63 }
 0xc4a   :  { %v672_v1 = vpop.permute.xlu1 %671 }
 0xc4b   :  { %v674_v4 = vsel %vm334_vm4, %v3901_v2, %v672_v1  ;;  %3455 = vmatprep.subr.bf16.mxu0 %v3454_v0 }
 0xc4c   :  { %3256 = vmatprep.mubr.msk.f32.mxu0 %vm189_vm2, %v674_v4  ;;  %3457 = vmatpush3.bf16.msra.mxu0 %v3454_v0 }
 0xc4d   :  { %v3673_v18 = vpop.eup %3672  ;;  %3459 = vmatprep.subr.bf16.mxu0 %v3458_v10 }
 0xc4e   :  { %v935_v6 = vmul.f32 %v3673_v18, %v3671_v32  ;;  %v1038_v14 = vpop.permute.xlu1 %1037 }
 0xc50   :  { %3246 = vmatmul.mubr.msk.f32.vlgmr.msra.gmra.mrb[16].mxu1 %vm415_vm5, %v935_v6  ;;  %3461 = vmatpush3.bf16.msra.mxu0 %v3458_v10 }
 0xc51   :  { %3465 = vmatpush3.bf16.msra.mxu1 %v3462_v40 }
 0xc52   :  { %3467 = vmatprep.subr.bf16.mxu1 %v3466_v46 }
 0xc55   :  { %3469 = vmatpush3.bf16.msra.mxu1 %v3466_v46 }
 0xd23   :  { %v1008_v11 = vpop.f32.mrb[16].mxu1 }
 0xd24   :  { %1013 = vrot.lane.b32.xlu0 %v1008_v11, %s3779_s8  ;;  %v3247_v12 = vpop.f32.mrb[17].mxu1 }
 0xd96   :  { %v1014_v13 = vpop.permute.xlu0 %1013 }
 0xd97   :  { %v1016_v2 = vsel %vm334_vm4, %v841_v50, %v1014_v13  ;;  %v1284_v50 = vld [vmem:[#allocation2 + $0xd0] sm:$0xff] }
 0xd98   :  { %3257 = vmatmul.mubr.msk.f32.vlgmr.msra.gmra.mrb[2].mxu0 %vm189_vm2, %v1016_v2  ;;  %v3583_v51 = vpack.i.bf16 %v1284_v50, %v1283_v49 }
 0xe6b   :  { %v3258_v16 = vpop.f32.mrb[2].mxu0 }
 0xe6c   :  { %v1118_v17 = vadd.f32 %v3258_v16, %v1038_v14  ;;  %v1112_v19 = vpop.f32.mrb[3].mxu0 }
 0xe6d   :  { %v1113_v20 = vadd.f32 %v1112_v19, %v1038_v14 }
 0xe6e   :  { %v1122_v21 = vadd.f32 %v1118_v17, %v3864_v44 }
 0xe6f   :  { %v1121_v22 = vadd.f32 %v1113_v20, %v3862_v43 }
 0xe70   :  { %v1128_v23 = vsel %vm189_vm2, %v1122_v21, 0.0 }
 0xe71   :  { %1129 = vadd.xlane.f32.xlu1 %v1128_v23  ;;  %v1125_v25 = vsel %vm189_vm2, %v1121_v22, 0.0 }
 0xe72   :  { %1126 = vadd.xlane.f32.xlu0 %v1125_v25  ;;  %v3004_v25 = vld [vmem:[#allocation2 + $0xe8] ss:$0 sm:$0xff] }
 0xe82   :  { %1156 = vrot.lane.b32.xlu1 %v2999_v26, %s3778_s7  ;;  %v3001_v26 = vld [vmem:[#allocation2 + $0xc8] ss:$0 sm:$0xff] }
 0xe86   :  { %3574 = vrot.lane.b32.xlu1 %v3573_v47, %s3774_s1 }
 0xe8a   :  { %3579 = vrot.lane.b32.xlu1 %v3578_v53, %s3774_s1 }
 0xe8e   :  { %3589 = vrot.lane.b32.xlu1 %v3588_v56, %s3774_s1 }
 0xefe   :  { %v1130_v27 = vpop.xlane.xlu1 %1129 }
 0xeff   :  { %v1132_v28 = vmul.f32 0.03125, %v1130_v27  ;;  %v1127_v29 = vpop.xlane.xlu0 %1126 }
 0xf00   :  { %v1131_v30 = vmul.f32 0.03125, %v1127_v29 }
 0xf01   :  { %v1134_v31 = vsub.f32 %v1122_v21, %v1132_v28 }
 0xf02   :  { %v1133_v34 = vsub.f32 %v1121_v22, %v1131_v30  ;;  %v1157_v62 = vpop.permute.xlu1 %1156 }
 0xf03   :  { %v1136_v36 = vmul.f32 %v1134_v31, %v1134_v31 }
 0xf04   :  { %v1135_v35 = vmul.f32 %v1133_v34, %v1133_v34 }
 0xf05   :  { %v1140_v43 = vsel %vm189_vm2, %v1136_v36, 0.0 }
 0xf06   :  { %v1137_v44 = vsel %vm189_vm2, %v1135_v35, 0.0  ;;  %v3575_v7 = vpop.permute.xlu1 %3574 }
 0xf07   :  { %1138 = vadd.xlane.f32.xlu0 %v1137_v44  ;;  %v3577_v8 = vunpack.i.h.bf16 %v3575_v7  ;;  %v3576_v9 = vunpack.i.l.bf16 %v3575_v7 }
 0xf09   :  { %v3470_v10 = vpack.c.bf16 %v3577_v8, %v3576_v9  ;;  %v1460_v8 = vld [vmem:[#allocation2 + $0xf0] sm:$0xff]  ;;  %v1461_v9 = vld [vmem:[#allocation2 + $0xf8] sm:$0xff] }
 0xf0a   :  { %v3580_v11 = vpop.permute.xlu1 %3579 }
 0xf0b   :  { %1141 = vadd.xlane.f32.xlu0 %v1140_v43  ;;  %v3582_v13 = vunpack.i.h.bf16 %v3580_v11  ;;  %v3581_v2 = vunpack.i.l.bf16 %v3580_v11  ;;  %3471 = vmatprep.subr.bf16.mxu0 %v3470_v10  ;;  %v3486_v11 = vpack.c.bf16 %v1461_v9, %v1460_v8 }
 0xf0c   :  { %3473 = vmatpush3.bf16.msra.mxu0 %v3470_v10  ;;  %v3007_v10 = vld [vmem:[#allocation2 + $0x38] ss:$0 sm:$0xff] }
 0xf0d   :  { %v3474_v17 = vpack.c.bf16 %v3582_v13, %v3581_v2  ;;  %3487 = vmatprep.subr.bf16.mxu1 %v3486_v11  ;;  %v1463_v13 = vld [vmem:[#allocation2 + $0x108] sm:$0xff] }
 0xf0e   :  { %v3590_v20 = vpop.permute.xlu1 %3589 }
 0xf0f   :  { %3475 = vmatprep.subr.bf16.mxu0 %v3474_v17  ;;  %v3592_v21 = vunpack.i.h.bf16 %v3590_v20  ;;  %v3591_v22 = vunpack.i.l.bf16 %v3590_v20 }
 0xf10   :  { %3477 = vmatpush3.bf16.msra.mxu0 %v3474_v17 }
 0xf11   :  { %v3482_v23 = vpack.c.bf16 %v3592_v21, %v3591_v22 }
 0xf21   :  { %1166 = vrot.lane.b32.xlu0 %v3000_v37, %s3778_s7 }
 0xf25   :  { %3584 = vrot.lane.b32.xlu0 %v3583_v51, %s3774_s1 }
 0xf29   :  { %1325 = vrot.lane.b32.xlu0 %v3004_v25, %s3774_s1 }
 0xf94   :  { %v1139_v57 = vpop.xlane.xlu0 %1138 }
 0xf95   :  { %v1143_v58 = vmul.f32 0.03125, %v1139_v57 }
 0xf97   :  { %v1145_v15 = vadd.f32 1e-12, %v1143_v58 }
 0xf98   :  { %v1142_v59 = vpop.xlane.xlu0 %1141 }
 0xf99   :  { %3674 = vrsqrt.f32 %v1145_v15  ;;  %v1144_v24 = vmul.f32 0.03125, %v1142_v59 }
 0xf9b   :  { %v1146_v32 = vadd.f32 1e-12, %v1144_v24 }
 0xf9c   :  { %v1167_v5 = vpop.permute.xlu0 %1166 }
 0xf9d   :  { %3676 = vrsqrt.f32 %v1146_v32 }
 0xfa0   :  { %v3585_v12 = vpop.permute.xlu0 %3584 }
 0xfa1   :  { %v3587_v14 = vunpack.i.h.bf16 %v3585_v12  ;;  %v3586_v16 = vunpack.i.l.bf16 %v3585_v12  ;;  %v1462_v12 = vld [vmem:[#allocation2 + $0x100] sm:$0xff] }
 0xfa2   :  { %v3490_v2 = vpack.c.bf16 %v1463_v13, %v1462_v12 }
 0xfa3   :  { %v3675_v60 = vpop.eup %3674  ;;  %v3478_v19 = vpack.c.bf16 %v3587_v14, %v3586_v16 }
 0xfa4   :  { %v1149_v3 = vmul.f32 %v3675_v60, %v1133_v34  ;;  %v1326_v54 = vpop.permute.xlu0 %1325 }
 0xfa5   :  { %3479 = vmatprep.subr.bf16.mxu0 %v3478_v19 }
 0xfa6   :  { %v1159_v63 = vmul.f32 %v1157_v62, %v1149_v3  ;;  %3481 = vmatpush3.bf16.msra.mxu0 %v3478_v19 }
 0xfa7   :  { %v3677_v0 = vpop.eup %3676  ;;  %3483 = vmatprep.subr.bf16.mxu0 %v3482_v23 }
 0xfa8   :  { %v1150_v1 = vmul.f32 %v3677_v0, %v1134_v31  ;;  %v3976_v4 = vadd.f32 %v1167_v5, %v1159_v63 }
 0xfaa   :  { %v1160_v18 = vmul.f32 %v1157_v62, %v1150_v1  ;;  %3267 = vmatprep.mubr.msk.f32.mxu1 %vm189_vm2, %v3976_v4  ;;  %3485 = vmatpush3.bf16.msra.mxu0 %v3482_v23 }
 0xfab   :  { %3310 = vmatprep.subr.mxu0 %v3772_v45 }
 0xfac   :  { %v3980_v6 = vadd.f32 %v1167_v5, %v1160_v18 }
 0xfae   :  { %3268 = vmatmul.mubr.msk.f32.vlgmr.msra.gmra.mrb[18].mxu1 %vm189_vm2, %v3980_v6 }
 0xfaf   :  { %3489 = vmatpush3.bf16.msra.mxu1 %v3486_v11 }
 0xfb0   :  { %3491 = vmatprep.subr.bf16.mxu1 %v3490_v2 }
 0xfb3   :  { %3493 = vmatpush3.bf16.msra.mxu1 %v3490_v2 }
 0xfb4   :  { %3300 = vmatprep.subr.mxu1 %v3772_v45 }
0x1081   :  { %v3269_v27 = vpop.f32.mrb[18].mxu1 }
0x1082   :  { %v1258_v28 = vadd.f32 %v3269_v27, %v3001_v26  ;;  %v1252_v29 = vpop.f32.mrb[19].mxu1 }
0x1083   :  { %v1253_v30 = vadd.f32 %v3001_v26, %v1252_v29 }
0x1084   :  { %v1264_v31 = vmul.f32 0.044715, %v1258_v28  ;;  %v1262_v50 = vmul.f32 0.5, %v1258_v28 }
0x1085   :  { %v1263_v34 = vmul.f32 0.044715, %v1253_v30  ;;  %v1261_v47 = vmul.f32 0.5, %v1253_v30 }
0x1086   :  { %v1266_v35 = vmul.f32 %v1264_v31, %v1258_v28 }
0x1087   :  { %v1265_v44 = vmul.f32 %v1263_v34, %v1253_v30 }
0x1088   :  { %v1268_v36 = vmul.f32 %v1266_v35, %v1258_v28  ;;  %v3009_v35 = vld [vmem:[#allocation2 + $0x110] ss:$0 sm:$0xff] }
0x1089   :  { %v1267_v43 = vmul.f32 %v1265_v44, %v1253_v30 }
0x108a   :  { %v1270_v37 = vadd.f32 %v1268_v36, %v1258_v28 }
0x108b   :  { %v1269_v38 = vadd.f32 %v1267_v43, %v1253_v30 }
0x108c   :  { %v1272_v39 = vmul.f32 0.7978846, %v1270_v37 }
0x108d   :  { %v1271_v40 = vmul.f32 0.7978846, %v1269_v38 }
0x108e   :  { %3678 = vtanh.f32 %v1272_v39 }
0x108f   :  { %3680 = vtanh.f32 %v1271_v40 }
0x1098   :  { %v3679_v41 = vpop.eup %3678 }
0x1099   :  { %v3681_v42 = vpop.eup %3680  ;;  %v1276_v46 = vadd.f32 1.0, %v3679_v41 }
0x109a   :  { %v1275_v49 = vadd.f32 1.0, %v3681_v42 }
0x109b   :  { %v1278_v53 = vmul.f32 %v1276_v46, %v1262_v50 }
0x109c   :  { %v1277_v51 = vmul.f32 %v1275_v49, %v1261_v47 }
0x109e   :  { %3286 = vmatprep.mubr.msk.f32.mxu0 %vm1328_vm6, %v1277_v51 }
0x109f   :  { %3287 = vmatmul.mubr.msk.f32.vlgmr.msra.gmra.mrb[4].mxu0 %vm1328_vm6, %v1278_v53 }
0x10a0   :  { %3312 = vmatprep.mubr.msk.f32.mxu0 %vm3773_vm3, %v3772_v45 }
0x1172   :  { %v3288_v55 = vpop.f32.mrb[4].mxu0 }
0x1173   :  { %v1407_v56 = vadd.f32 %v3288_v55, %v1326_v54  ;;  %v1401_v57 = vpop.f32.mrb[5].mxu0 }
0x1174   :  { %v1402_v58 = vadd.f32 %v1401_v57, %v1326_v54 }
0x1175   :  { %v1411_v15 = vadd.f32 %v1407_v56, %v3980_v6 }
0x1176   :  { %v1410_v59 = vadd.f32 %v1402_v58, %v3976_v4  ;;  %v3008_v4 = vld [vmem:[#allocation2 + $0x40] ss:$0 sm:$0xff] }
0x1177   :  { %v1417_v24 = vsel %vm189_vm2, %v1411_v15, 0.0 }
0x1178   :  { %1418 = vadd.xlane.f32.xlu0 %v1417_v24  ;;  %v1414_v32 = vsel %vm189_vm2, %v1410_v59, 0.0 }
0x1179   :  { %1415 = vadd.xlane.f32.xlu1 %v1414_v32 }
0x1205   :  { %v1419_v60 = vpop.xlane.xlu0 %1418 }
0x1206   :  { %v1421_v62 = vmul.f32 0.03125, %v1419_v60  ;;  %v1416_v3 = vpop.xlane.xlu1 %1415 }
0x1207   :  { %v1420_v5 = vmul.f32 0.03125, %v1416_v3 }
0x1208   :  { %v1423_v63 = vsub.f32 %v1411_v15, %v1421_v62 }
0x1209   :  { %v1422_v0 = vsub.f32 %v1410_v59, %v1420_v5 }
0x120a   :  { %v1425_v1 = vmul.f32 %v1423_v63, %v1423_v63 }
0x120b   :  { %v1424_v18 = vmul.f32 %v1422_v0, %v1422_v0 }
0x120c   :  { %v1429_v7 = vsel %vm189_vm2, %v1425_v1, 0.0 }
0x120d   :  { %1430 = vadd.xlane.f32.xlu1 %v1429_v7  ;;  %v1426_v6 = vsel %vm189_vm2, %v1424_v18, 0.0 }
0x120e   :  { %1427 = vadd.xlane.f32.xlu0 %v1426_v6 }
0x121e   :  { %1455 = vrot.lane.b32.xlu1 %v3008_v4, %s3778_s7 }
0x1224   :  { %1445 = vrot.lane.b32.xlu0 %v3007_v10, %s3778_s7 }
0x129a   :  { %v1431_v14 = vpop.xlane.xlu1 %1430 }
0x129b   :  { %v1433_v16 = vmul.f32 0.03125, %v1431_v14  ;;  %v1428_v17 = vpop.xlane.xlu0 %1427 }
0x129c   :  { %v1432_v19 = vmul.f32 0.03125, %v1428_v17 }
0x129d   :  { %v1435_v20 = vadd.f32 1e-12, %v1433_v16 }
0x129e   :  { %v1434_v21 = vadd.f32 1e-12, %v1432_v19  ;;  %v1456_v29 = vpop.permute.xlu1 %1455 }
0x129f   :  { %3682 = vrsqrt.f32 %v1435_v20  ;;  %v1446_v23 = vpop.permute.xlu0 %1445 }
0x12a0   :  { %3684 = vrsqrt.f32 %v1434_v21 }
0x12a9   :  { %v3683_v22 = vpop.eup %3682 }
0x12aa   :  { %v3685_v25 = vpop.eup %3684  ;;  %v1439_v26 = vmul.f32 %v3683_v22, %v1423_v63 }
0x12ab   :  { %v1438_v27 = vmul.f32 %v3685_v25, %v1422_v0 }
0x12ac   :  { %v1449_v28 = vmul.f32 %v1446_v23, %v1439_v26 }
0x12ad   :  { %v1448_v30 = vmul.f32 %v1446_v23, %v1438_v27 }
0x12ae   :  { %v4001_v34 = vadd.f32 %v1456_v29, %v1449_v28 }
0x12af   :  { %v3999_v31 = vadd.f32 %v1456_v29, %v1448_v30 }
0x12b1   :  { %3297 = vmatprep.mubr.msk.f32.mxu1 %vm189_vm2, %v3999_v31 }
0x12b2   :  { %3298 = vmatmul.mubr.msk.f32.vlgmr.msra.gmra.mrb[20].mxu1 %vm189_vm2, %v4001_v34 }
0x12b3   :  { %3302 = vmatprep.mubr.msk.f32.mxu1 %vm3773_vm3, %v3772_v45 }
0x1385   :  { %v3299_v44 = vpop.f32.mrb[20].mxu1 }
0x1386   :  { %v1541_v36 = vpop.f32.mrb[21].mxu1  ;;  %v4015_v37 = vadd.f32 %v3299_v44, %v3009_v35 }
0x1387   :  { %v4009_v43 = vadd.f32 %v3009_v35, %v1541_v36 }
0x1389   :  { %1718 = vrot.lane.b32.xlu0 %v4009_v43, %s3776_s5  ;;  %1551 = vrot.lane.b32.xlu1 %v4009_v43, %s3770_s30 }
0x138d   :  { %1889 = vrot.lane.b32.xlu0 %v4015_v37, %s3770_s30  ;;  %1716 = vrot.lane.b32.xlu1 %v4009_v43, %s3775_s4 }
0x1391   :  { %2054 = vrot.lane.b32.xlu0 %v4015_v37, %s3775_s4  ;;  %2056 = vrot.lane.b32.xlu1 %v4015_v37, %s3776_s5 }
0x13fb   :  { %v1719_v38 = vpop.permute.xlu0 %1718  ;;  %v1552_v39 = vpop.permute.xlu1 %1551 }
0x13fc   :  { %3301 = vmatpush3.xpose.msk.msra.mxu1 %vm334_vm4, %v1552_v39  ;;  %3311 = vmatpush3.xpose.msk.msra.mxu0 %vm334_vm4, %v1719_v38 }
0x13fd   :  { %3320 = vmatprep.subr.mxu0 %v3772_v45  ;;  %3305 = vmatprep.subr.mxu1 %v3772_v45 }
0x13ff   :  { %v1890_v40 = vpop.permute.xlu0 %1889  ;;  %3303 = vmatmul.mubr.msk.f32.vlgmr.msra.gmra.mrb[22].mxu1 %vm334_vm4, %v4009_v43  ;;  %v1717_v41 = vpop.permute.xlu1 %1716 }
0x1400   :  { %3313 = vmatmul.mubr.msk.f32.vlgmr.msra.gmra.mrb[6].mxu0 %vm334_vm4, %v1717_v41  ;;  %3307 = vmatprep.mubr.msk.f32.mxu1 %vm3773_vm3, %v3772_v45  ;;  %v2226_v41 = vld [vmem:[#allocation2 + $0x48] sm:$0xff] }
0x1401   :  { %3321 = vmatpush3.xpose.msk.msra.mxu0 %vm334_vm4, %v1890_v40  ;;  %3322 = vmatprep.mubr.msk.f32.mxu0 %vm3773_vm3, %v3772_v45 }
0x1402   :  { %3330 = vmatprep.subr.mxu0 %v3772_v45 }
0x1403   :  { %v2057_v42 = vpop.permute.xlu1 %2056  ;;  %v2055_v46 = vpop.permute.xlu0 %2054 }
0x1404   :  { %3323 = vmatmul.mubr.msk.f32.vlgmr.msra.gmra.mrb[8].mxu0 %vm334_vm4, %v4015_v37 }
0x1405   :  { %3331 = vmatpush3.xpose.msk.msra.mxu0 %vm334_vm4, %v2057_v42  ;;  %3332 = vmatprep.mubr.msk.f32.mxu0 %vm3773_vm3, %v3772_v45  ;;  %v2227_v42 = vld [vmem:[#allocation2 + $0x50] sm:$0xff] }
0x1408   :  { %3333 = vmatmul.mubr.msk.f32.vlgmr.msra.gmra.mrb[10].mxu0 %vm334_vm4, %v2055_v46  ;;  %v3593_v46 = vpack.i.bf16 %v2227_v42, %v2226_v41 }
0x14d2   :  { %v1623_v47 = vpop.f32.mrb[22].mxu1 }
0x14d3   :  { %v1627_v49 = vmul.f32 0.25, %v1623_v47  ;;  %v3304_v50 = vpop.f32.mrb[23].mxu1  ;;  %v1790_v51 = vpop.f32.mrb[6].mxu0  ;;  %v2228_v47 = vld [vmem:[#allocation2 + $0x58] sm:$0xff] }
0x14d4   :  { %v1794_v53 = vmul.f32 0.25, %v1790_v51  ;;  %v3314_v54 = vpop.f32.mrb[7].mxu0 }
0x14d5   :  { %v1628_v55 = vadd.f32 %v1627_v49, %v3884_v52  ;;  %v2229_v49 = vld [vmem:[#allocation2 + $0x60] sm:$0xff] }
0x14d6   :  { %v1795_v56 = vadd.f32 %v1794_v53, %v3884_v52  ;;  %v3598_v50 = vpack.i.bf16 %v2229_v49, %v2228_v47 }
0x14d7   :  { %v1961_v57 = vpop.f32.mrb[8].mxu0  ;;  %v1629_v58 = vsel %vm415_vm5, %v1628_v55, -inf }
0x14d8   :  { %v1965_v15 = vmul.f32 0.25, %v1961_v57  ;;  %1630 = vmax.xlane.f32.xlu1 %v1629_v58  ;;  %v3324_v59 = vpop.f32.mrb[9].mxu0  ;;  %v1796_v24 = vsel %vm415_vm5, %v1795_v56, -inf }
0x14d9   :  { %1797 = vmax.xlane.f32.xlu0 %v1796_v24 }
0x14da   :  { %v1966_v32 = vadd.f32 %v1965_v15, %v3848_v33 }
0x14db   :  { %v2128_v60 = vpop.f32.mrb[10].mxu0 }
0x14dc   :  { %v2132_v62 = vmul.f32 0.25, %v2128_v60  ;;  %v3334_v3 = vpop.f32.mrb[11].mxu0  ;;  %v1967_v5 = vsel %vm415_vm5, %v1966_v32, -inf }
0x14dd   :  { %1968 = vmax.xlane.f32.xlu0 %v1967_v5 }
0x14de   :  { %v2133_v63 = vadd.f32 %v2132_v62, %v3848_v33  ;;  %v3024_v62 = vld [vmem:[#allocation2 + $0x68] ss:$0 sm:$0xff] }
0x14e0   :  { %v2134_v52 = vsel %vm415_vm5, %v2133_v63, -inf }
0x14e1   :  { %2135 = vmax.xlane.f32.xlu1 %v2134_v52 }
0x14f2   :  { %1807 = vrot.lane.b32.xlu1 %v4009_v43, %s3777_s6 }
0x1565   :  { %v1631_v0 = vpop.xlane.xlu1 %1630 }
0x1566   :  { %v1632_v1 = vsub.f32 %v1628_v55, %v1631_v0  ;;  %v1798_v18 = vpop.xlane.xlu0 %1797 }
0x1567   :  { %v1799_v7 = vsub.f32 %v1795_v56, %v1798_v18 }
0x1568   :  { %v1633_v6 = vmul.f32 1.442695, %v1632_v1 }
0x1569   :  { %v1800_v4 = vmul.f32 1.442695, %v1799_v7 }
0x156a   :  { %3686 = vpow2.f32 %v1633_v6  ;;  %v1969_v16 = vpop.xlane.xlu0 %1968 }
0x156b   :  { %3688 = vpow2.f32 %v1800_v4  ;;  %v1970_v17 = vsub.f32 %v1966_v32, %v1969_v16 }
0x156d   :  { %v1971_v19 = vmul.f32 1.442695, %v1970_v17 }
0x156e   :  { %v2136_v8 = vpop.xlane.xlu1 %2135 }
0x156f   :  { %v2137_v9 = vsub.f32 %v2133_v63, %v2136_v8 }
0x1571   :  { %v2138_v10 = vmul.f32 1.442695, %v2137_v9 }
0x1572   :  { %v1808_v22 = vpop.permute.xlu1 %1807 }
0x1573   :  { %3690 = vpow2.f32 %v2138_v10 }
0x1574   :  { %v3687_v11 = vpop.eup %3686  ;;  %3692 = vpow2.f32 %v1971_v19 }
0x1575   :  { %v3689_v33 = vpop.eup %3688  ;;  %v1635_v12 = vsel %vm415_vm5, %v3687_v11, 0.0 }
0x1576   :  { %1636 = vadd.xlane.f32.xlu0 %v1635_v12  ;;  %v1802_v13 = vsel %vm415_vm5, %v3689_v33, 0.0 }
0x1577   :  { %1803 = vadd.xlane.f32.xlu1 %v1802_v13 }
0x157d   :  { %v3691_v2 = vpop.eup %3690 }
0x157e   :  { %v2140_v14 = vsel %vm415_vm5, %v3691_v2, 0.0  ;;  %v3693_v20 = vpop.eup %3692 }
0x157f   :  { %2141 = vadd.xlane.f32.xlu1 %v2140_v14  ;;  %v1973_v21 = vsel %vm415_vm5, %v3693_v20, 0.0 }
0x158c   :  { %1640 = vrot.lane.b32.xlu0 %v4009_v43, %s3774_s1 }
0x1590   :  { %1978 = vrot.lane.b32.xlu1 %v4015_v37, %s3774_s1 }
0x1594   :  { %3594 = vrot.lane.b32.xlu1 %v3593_v46, %s3778_s7 }
0x15ab   :  { %1974 = vadd.xlane.f32.xlu0 %v1973_v21 }
0x15c1   :  { %2145 = vrot.lane.b32.xlu0 %v4015_v37, %s3777_s6 }
0x15c5   :  { %3599 = vrot.lane.b32.xlu0 %v3598_v50, %s3778_s7 }
0x1603   :  { %v1637_v23 = vpop.xlane.xlu0 %1636 }
0x1604   :  { %3694 = vrcp.f32 %v1637_v23  ;;  %v1804_v25 = vpop.xlane.xlu1 %1803 }
0x1605   :  { %3696 = vrcp.f32 %v1804_v25  ;;  %v3028_v25 = vld [vmem:[#allocation2 + $0x78] ss:$0 sm:$0xff] }
0x1607   :  { %v1641_v26 = vpop.permute.xlu0 %1640 }
0x1608   :  { %3306 = vmatpush3.msra.mxu1 %v1641_v26  ;;  %v2386_v26 = vld [vmem:[#allocation2 + $0x118] sm:$0xff] }
0x1609   :  { %3315 = vmatprep.subr.mxu1 %v3772_v45 }
0x160c   :  { %v2142_v29 = vpop.xlane.xlu1 %2141 }
0x160e   :  { %v3695_v27 = vpop.eup %3694 }
0x160f   :  { %v1639_v28 = vmul.f32 %v3695_v27, %v3687_v11  ;;  %v3697_v30 = vpop.eup %3696  ;;  %v2387_v27 = vld [vmem:[#allocation2 + $0x120] sm:$0xff] }
0x1610   :  { %v1806_v35 = vmul.f32 %v3697_v30, %v3689_v33  ;;  %v1979_v44 = vpop.permute.xlu1 %1978  ;;  %v2389_v30 = vld [vmem:[#allocation2 + $0x130] sm:$0xff] }
0x1611   :  { %3308 = vmatmul.mubr.msk.f32.vlgmr.msra.gmra.mrb[24].mxu1 %vm415_vm5, %v1639_v28  ;;  %v3502_v28 = vpack.c.bf16 %v2387_v27, %v2386_v26 }
0x1612   :  { %3316 = vmatpush3.msra.mxu1 %v1808_v22  ;;  %3317 = vmatprep.mubr.msk.f32.mxu1 %vm3773_vm3, %v3772_v45 }
0x1613   :  { %3325 = vmatprep.subr.mxu1 %v3772_v45 }
0x1614   :  { %v3595_v51 = vpop.permute.xlu1 %3594 }
0x1615   :  { %3318 = vmatmul.mubr.msk.f32.vlgmr.msra.gmra.mrb[26].mxu1 %vm415_vm5, %v1806_v35  ;;  %v3597_v53 = vunpack.i.h.bf16 %v3595_v51  ;;  %v3596_v54 = vunpack.i.l.bf16 %v3595_v51 }
0x1616   :  { %3326 = vmatpush3.msra.mxu1 %v1979_v44  ;;  %3327 = vmatprep.mubr.msk.f32.mxu1 %vm3773_vm3, %v3772_v45  ;;  %v3603_v44 = vpack.i.bf16 %v2387_v27, %v2386_v26 }
0x1617   :  { %3335 = vmatprep.subr.mxu1 %v3772_v45  ;;  %v3494_v55 = vpack.c.bf16 %v3597_v53, %v3596_v54 }
0x1619   :  { %3495 = vmatprep.subr.bf16.mxu0 %v3494_v55 }
0x161a   :  { %3497 = vmatpush3.bf16.msra.mxu0 %v3494_v55 }
0x1638   :  { %v1975_v36 = vpop.xlane.xlu0 %1974 }
0x1639   :  { %3698 = vrcp.f32 %v1975_v36  ;;  %v2498_v36 = vld [vmem:[#allocation2 + $0x138] sm:$0xff] }
0x163a   :  { %3700 = vrcp.f32 %v2142_v29  ;;  %v2388_v29 = vld [vmem:[#allocation2 + $0x128] sm:$0xff] }
0x163b   :  { %v3506_v35 = vpack.c.bf16 %v2389_v30, %v2388_v29 }
0x163c   :  { %v2146_v39 = vpop.permute.xlu0 %2145 }
0x1640   :  { %v3600_v56 = vpop.permute.xlu0 %3599 }
0x1641   :  { %v3602_v57 = vunpack.i.h.bf16 %v3600_v56  ;;  %v3601_v58 = vunpack.i.l.bf16 %v3600_v56 }
0x1643   :  { %v3699_v43 = vpop.eup %3698  ;;  %v3498_v15 = vpack.c.bf16 %v3602_v57, %v3601_v58 }
0x1644   :  { %v1977_v37 = vmul.f32 %v3699_v43, %v3693_v20  ;;  %v3701_v38 = vpop.eup %3700  ;;  %v2499_v43 = vld [vmem:[#allocation2 + $0x140] sm:$0xff] }
0x1645   :  { %v2144_v40 = vmul.f32 %v3701_v38, %v3691_v2  ;;  %3499 = vmatprep.subr.bf16.mxu0 %v3498_v15  ;;  %v3027_v2 = vld [vmem:[#allocation2 + $0x70] ss:$0 sm:$0xff]  ;;  %v3608_v38 = vpack.i.bf16 %v2389_v30, %v2388_v29 }
0x1646   :  { %3328 = vmatmul.mubr.msk.f32.vlgmr.msra.gmra.mrb[28].mxu1 %vm415_vm5, %v1977_v37  ;;  %3501 = vmatpush3.bf16.msra.mxu0 %v3498_v15  ;;  %v3613_v37 = vpack.i.bf16 %v2499_v43, %v2498_v36 }
0x1647   :  { %3336 = vmatpush3.msra.mxu1 %v2146_v39  ;;  %3337 = vmatprep.mubr.msk.f32.mxu1 %vm3773_vm3, %v3772_v45  ;;  %v2500_v39 = vld [vmem:[#allocation2 + $0x148] sm:$0xff] }
0x1648   :  { %3503 = vmatprep.subr.bf16.mxu1 %v3502_v28 }
0x164a   :  { %3338 = vmatmul.mubr.msk.f32.vlgmr.msra.gmra.mrb[30].mxu1 %vm415_vm5, %v2144_v40  ;;  %v2501_v40 = vld [vmem:[#allocation2 + $0x150] sm:$0xff] }
0x164b   :  { %3505 = vmatpush3.bf16.msra.mxu1 %v3502_v28  ;;  %v3618_v41 = vpack.i.bf16 %v2501_v40, %v2500_v39 }
0x164c   :  { %3507 = vmatprep.subr.bf16.mxu1 %v3506_v35 }
0x164f   :  { %3509 = vmatpush3.bf16.msra.mxu1 %v3506_v35 }
0x16e4   :  { %v1712_v59 = vpop.f32.mrb[24].mxu1 }
0x16e5   :  { %v3309_v24 = vpop.f32.mrb[25].mxu1 }
0x16e8   :  { %v1879_v32 = vpop.f32.mrb[26].mxu1 }
0x16e9   :  { %1884 = vrot.lane.b32.xlu1 %v1879_v32, %s3779_s8  ;;  %v3319_v60 = vpop.f32.mrb[27].mxu1 }
0x16ed   :  { %2252 = vrot.lane.b32.xlu1 %v3024_v62, %s3778_s7 }
0x1719   :  { %v2050_v3 = vpop.f32.mrb[28].mxu1 }
0x171a   :  { %v3329_v5 = vpop.f32.mrb[29].mxu1 }
0x171d   :  { %v2217_v63 = vpop.f32.mrb[30].mxu1 }
0x171e   :  { %2222 = vrot.lane.b32.xlu0 %v2217_v63, %s3779_s8  ;;  %v3339_v52 = vpop.f32.mrb[31].mxu1 }
0x175b   :  { %v1885_v0 = vpop.permute.xlu1 %1884 }
0x175c   :  { %v1887_v1 = vsel %vm334_vm4, %v1712_v59, %v1885_v0 }
0x175d   :  { %3348 = vmatprep.mubr.msk.f32.mxu0 %vm189_vm2, %v1887_v1 }
0x175f   :  { %v2253_v6 = vpop.permute.xlu1 %2252 }
0x1790   :  { %v2223_v18 = vpop.permute.xlu0 %2222 }
0x1791   :  { %v2225_v7 = vsel %vm334_vm4, %v2050_v3, %v2223_v18 }
0x1792   :  { %3349 = vmatmul.mubr.msk.f32.vlgmr.msra.gmra.mrb[12].mxu0 %vm189_vm2, %v2225_v7 }
0x1865   :  { %v3350_v4 = vpop.f32.mrb[12].mxu0 }
0x1866   :  { %v2333_v8 = vadd.f32 %v3350_v4, %v2253_v6  ;;  %v2327_v9 = vpop.f32.mrb[13].mxu0 }
0x1867   :  { %v2328_v10 = vadd.f32 %v2327_v9, %v2253_v6 }
0x1868   :  { %v2337_v11 = vadd.f32 %v2333_v8, %v4001_v34 }
0x1869   :  { %v2336_v33 = vadd.f32 %v2328_v10, %v3999_v31 }
0x186a   :  { %v2343_v12 = vsel %vm189_vm2, %v2337_v11, 0.0 }
0x186b   :  { %2344 = vadd.xlane.f32.xlu1 %v2343_v12  ;;  %v2340_v13 = vsel %vm189_vm2, %v2336_v33, 0.0  ;;  %v3029_v12 = vld [vmem:[#allocation2 + $0x138] ss:$0 sm:$0xff] }
0x186c   :  { %2341 = vadd.xlane.f32.xlu0 %v2340_v13 }
0x187c   :  { %2371 = vrot.lane.b32.xlu1 %v3027_v2, %s3778_s7 }
0x1880   :  { %3604 = vrot.lane.b32.xlu1 %v3603_v44, %s3774_s1 }
0x1884   :  { %3609 = vrot.lane.b32.xlu1 %v3608_v38, %s3774_s1 }
0x1888   :  { %3619 = vrot.lane.b32.xlu1 %v3618_v41, %s3774_s1 }
0x18f8   :  { %v2345_v14 = vpop.xlane.xlu1 %2344 }
0x18f9   :  { %v2347_v16 = vmul.f32 0.03125, %v2345_v14  ;;  %v2342_v17 = vpop.xlane.xlu0 %2341 }
0x18fa   :  { %v2346_v19 = vmul.f32 0.03125, %v2342_v17 }
0x18fb   :  { %v2349_v20 = vsub.f32 %v2337_v11, %v2347_v16 }
0x18fc   :  { %v2348_v21 = vsub.f32 %v2336_v33, %v2346_v19  ;;  %v2372_v54 = vpop.permute.xlu1 %2371  ;;  %v3032_v33 = vld [vmem:[#allocation2 + $0x158] ss:$0 sm:$0xff] }
0x18fd   :  { %v2351_v23 = vmul.f32 %v2349_v20, %v2349_v20 }
0x18fe   :  { %v2350_v22 = vmul.f32 %v2348_v21, %v2348_v21 }
0x18ff   :  { %v2355_v31 = vsel %vm189_vm2, %v2351_v23, 0.0 }
0x1900   :  { %v2352_v34 = vsel %vm189_vm2, %v2350_v22, 0.0  ;;  %v3605_v60 = vpop.permute.xlu1 %3604 }
0x1901   :  { %2353 = vadd.xlane.f32.xlu0 %v2352_v34  ;;  %v3607_v62 = vunpack.i.h.bf16 %v3605_v60  ;;  %v3606_v3 = vunpack.i.l.bf16 %v3605_v60  ;;  %v2680_v60 = vld [vmem:[#allocation2 + $0x30] sm:$0xff] }
0x1903   :  { %v3510_v5 = vpack.c.bf16 %v3607_v62, %v3606_v3  ;;  %v3036_v62 = vld [vmem:[#allocation2 + $0x88] ss:$0 sm:$0xff] }
0x1904   :  { %v3610_v63 = vpop.permute.xlu1 %3609 }
0x1905   :  { %2356 = vadd.xlane.f32.xlu0 %v2355_v31  ;;  %v3612_v0 = vunpack.i.h.bf16 %v3610_v63  ;;  %v3611_v1 = vunpack.i.l.bf16 %v3610_v63  ;;  %3511 = vmatprep.subr.bf16.mxu0 %v3510_v5  ;;  %v2682_v63 = vld [vmem:[#allocation2 + $0x40] sm:$0xff] }
0x1906   :  { %3513 = vmatpush3.bf16.msra.mxu0 %v3510_v5  ;;  %v2681_v5 = vld [vmem:[#allocation2 + $0x38] sm:$0xff] }
0x1907   :  { %v3514_v6 = vpack.c.bf16 %v3612_v0, %v3611_v1  ;;  %v3628_v0 = vpack.i.bf16 %v2682_v63, %v2681_v5  ;;  %v3037_v1 = vld [vmem:[#allocation2 + $0x48] ss:$0 sm:$0xff] }
0x1908   :  { %v3620_v8 = vpop.permute.xlu1 %3619 }
0x1909   :  { %3515 = vmatprep.subr.bf16.mxu0 %v3514_v6  ;;  %v3622_v9 = vunpack.i.h.bf16 %v3620_v8  ;;  %v3621_v10 = vunpack.i.l.bf16 %v3620_v8 }
0x190a   :  { %3517 = vmatpush3.bf16.msra.mxu0 %v3514_v6 }
0x190b   :  { %v3522_v11 = vpack.c.bf16 %v3622_v9, %v3621_v10 }
0x191b   :  { %2381 = vrot.lane.b32.xlu0 %v3028_v25, %s3778_s7 }
0x191f   :  { %3614 = vrot.lane.b32.xlu0 %v3613_v37, %s3774_s1 }
0x1923   :  { %2540 = vrot.lane.b32.xlu0 %v3032_v33, %s3774_s1 }
0x198e   :  { %v2354_v42 = vpop.xlane.xlu0 %2353 }
0x198f   :  { %v2358_v46 = vmul.f32 0.03125, %v2354_v42 }
0x1991   :  { %v2360_v47 = vadd.f32 1e-12, %v2358_v46 }
0x1992   :  { %v2357_v49 = vpop.xlane.xlu0 %2356 }
0x1993   :  { %3702 = vrsqrt.f32 %v2360_v47  ;;  %v2359_v50 = vmul.f32 0.03125, %v2357_v49 }
0x1995   :  { %v2361_v51 = vadd.f32 1e-12, %v2359_v50  ;;  %v3035_v50 = vld [vmem:[#allocation2 + $0x80] ss:$0 sm:$0xff] }
0x1996   :  { %v2382_v56 = vpop.permute.xlu0 %2381 }
0x1997   :  { %3704 = vrsqrt.f32 %v2361_v51 }
0x199a   :  { %v3615_v52 = vpop.permute.xlu0 %3614 }
0x199b   :  { %v3617_v18 = vunpack.i.h.bf16 %v3615_v52  ;;  %v3616_v7 = vunpack.i.l.bf16 %v3615_v52  ;;  %v3780_v52 = vmov 0.0|0.0  }
0x199c   :  { %3526 = vmatprep.subr.bf16.mxu1 %v3780_v52 }
0x199d   :  { %v3703_v53 = vpop.eup %3702  ;;  %v3518_v4 = vpack.c.bf16 %v3617_v18, %v3616_v7  ;;  %v3716_v18 = vld [vmem:[#allocation2 + $0x20] ss:$0 sm:$0xff] }
0x199e   :  { %v2364_v55 = vmul.f32 %v3703_v53, %v2348_v21  ;;  %v2541_v37 = vpop.permute.xlu0 %2540 }
0x199f   :  { %3519 = vmatprep.subr.bf16.mxu0 %v3518_v4 }
0x19a0   :  { %v2374_v57 = vmul.f32 %v2372_v54, %v2364_v55  ;;  %3521 = vmatpush3.bf16.msra.mxu0 %v3518_v4 }
0x19a1   :  { %v3705_v58 = vpop.eup %3704  ;;  %3523 = vmatprep.subr.bf16.mxu0 %v3522_v11 }
0x19a2   :  { %v2365_v15 = vmul.f32 %v3705_v58, %v2349_v20  ;;  %v4098_v59 = vadd.f32 %v2382_v56, %v2374_v57 }
0x19a4   :  { %v2375_v24 = vmul.f32 %v2372_v54, %v2365_v15  ;;  %3359 = vmatprep.mubr.msk.f32.mxu1 %vm189_vm2, %v4098_v59  ;;  %3525 = vmatpush3.bf16.msra.mxu0 %v3522_v11 }
0x19a5   :  { %3538 = vmatprep.subr.bf16.mxu0 %v3780_v52 }
0x19a6   :  { %v2385_v32 = vadd.f32 %v2382_v56, %v2375_v24 }
0x19a8   :  { %3360 = vmatmul.mubr.msk.f32.vlgmr.msra.gmra.mrb[32].mxu1 %vm189_vm2, %v2385_v32 }
0x19a9   :  { %3389 = vmatprep.mubr.msk.f32.mxu1 %vm3773_vm3, %v3772_v45 }
0x1a7b   :  { %v3361_v13 = vpop.f32.mrb[32].mxu1 }
0x1a7c   :  { %v2473_v2 = vadd.f32 %v3361_v13, %v3029_v12  ;;  %v2467_v14 = vpop.f32.mrb[33].mxu1 }
0x1a7d   :  { %v2468_v16 = vadd.f32 %v3029_v12, %v2467_v14 }
0x1a7e   :  { %v2479_v17 = vmul.f32 0.044715, %v2473_v2  ;;  %v2477_v44 = vmul.f32 0.5, %v2473_v2 }
0x1a7f   :  { %v2478_v19 = vmul.f32 0.044715, %v2468_v16  ;;  %v2476_v30 = vmul.f32 0.5, %v2468_v16 }
0x1a80   :  { %v2481_v20 = vmul.f32 %v2479_v17, %v2473_v2 }
0x1a81   :  { %v2480_v21 = vmul.f32 %v2478_v19, %v2468_v16 }
0x1a82   :  { %v2483_v22 = vmul.f32 %v2481_v20, %v2473_v2 }
0x1a83   :  { %v2482_v34 = vmul.f32 %v2480_v21, %v2468_v16 }
0x1a84   :  { %v2485_v23 = vadd.f32 %v2483_v22, %v2473_v2 }
0x1a85   :  { %v2484_v31 = vadd.f32 %v2482_v34, %v2468_v16 }
0x1a86   :  { %v2487_v25 = vmul.f32 0.7978846, %v2485_v23 }
0x1a87   :  { %v2486_v26 = vmul.f32 0.7978846, %v2484_v31 }
0x1a88   :  { %3706 = vtanh.f32 %v2487_v25 }
0x1a89   :  { %3708 = vtanh.f32 %v2486_v26 }
0x1a92   :  { %v3707_v27 = vpop.eup %3706 }
0x1a93   :  { %v3709_v28 = vpop.eup %3708  ;;  %v2491_v29 = vadd.f32 1.0, %v3707_v27 }
0x1a94   :  { %v2490_v35 = vadd.f32 1.0, %v3709_v28 }
0x1a95   :  { %v2493_v43 = vmul.f32 %v2491_v29, %v2477_v44 }
0x1a96   :  { %v2492_v36 = vmul.f32 %v2490_v35, %v2476_v30 }
0x1a98   :  { %3378 = vmatprep.mubr.msk.f32.mxu0 %vm1328_vm6, %v2492_v36 }
0x1a99   :  { %3379 = vmatmul.mubr.msk.f32.vlgmr.msra.gmra.mrb[14].mxu0 %vm1328_vm6, %v2493_v43 }
0x1a9a   :  { %3411 = vmatprep.mubr.msk.f32.mxu0 %vm3773_vm3, %v3772_v45 }
0x1b6c   :  { %v3380_v38 = vpop.f32.mrb[14].mxu0 }
0x1b6d   :  { %v2621_v39 = vadd.f32 %v3380_v38, %v2541_v37  ;;  %v2615_v40 = vpop.f32.mrb[15].mxu0 }
0x1b6e   :  { %v2616_v41 = vadd.f32 %v2615_v40, %v2541_v37 }
0x1b6f   :  { %v2625_v42 = vadd.f32 %v2621_v39, %v2385_v32  ;;  %v2679_v32 = vld [vmem:[#allocation2 + $0x28] sm:$0xff] }
0x1b70   :  { %v2624_v46 = vadd.f32 %v2616_v41, %v4098_v59  ;;  %v3623_v3 = vpack.i.bf16 %v2680_v60, %v2679_v32 }
0x1b71   :  { %v2631_v47 = vsel %vm189_vm2, %v2625_v42, 0.0 }
0x1b72   :  { %2632 = vadd.xlane.f32.xlu1 %v2631_v47  ;;  %v2628_v49 = vsel %vm189_vm2, %v2624_v46, 0.0 }
0x1b73   :  { %2629 = vadd.xlane.f32.xlu0 %v2628_v49 }
0x1b83   :  { %2659 = vrot.lane.b32.xlu1 %v3035_v50, %s3778_s7 }
0x1bff   :  { %v2633_v51 = vpop.xlane.xlu1 %2632 }
0x1c00   :  { %v2635_v53 = vmul.f32 0.03125, %v2633_v51  ;;  %v2630_v54 = vpop.xlane.xlu0 %2629 }
0x1c01   :  { %v2634_v55 = vmul.f32 0.03125, %v2630_v54 }
0x1c02   :  { %v2637_v56 = vsub.f32 %v2625_v42, %v2635_v53 }
0x1c03   :  { %v2636_v57 = vsub.f32 %v2624_v46, %v2634_v55  ;;  %v2660_v7 = vpop.permute.xlu1 %2659 }
0x1c04   :  { %v2639_v58 = vmul.f32 %v2637_v56, %v2637_v56 }
0x1c05   :  { %v2638_v15 = vmul.f32 %v2636_v57, %v2636_v57 }
0x1c06   :  { %v2643_v24 = vsel %vm189_vm2, %v2639_v58, 0.0 }
0x1c07   :  { %2644 = vadd.xlane.f32.xlu0 %v2643_v24  ;;  %v2640_v59 = vsel %vm189_vm2, %v2638_v15, 0.0 }
0x1c08   :  { %2641 = vadd.xlane.f32.xlu1 %v2640_v59 }
0x1c19   :  { %2669 = vrot.lane.b32.xlu1 %v3036_v62, %s3778_s7 }
0x1c1d   :  { %3624 = vrot.lane.b32.xlu0 %v3623_v3, %s3770_s30  ;;  %2705 = vrot.lane.b32.xlu1 %v3037_v1, %s3770_s30 }
0x1c21   :  { %3629 = vrot.lane.b32.xlu0 %v3628_v0, %s3770_s30  ;;  %3639 = vrot.lane.b32.xlu1 %v3953_v48, %s3774_s1 }
0x1c25   :  { %3634 = vrot.lane.b32.xlu0 %v3944_v61, %s3774_s1  ;;  %3649 = vrot.lane.b32.xlu1 %v3628_v0, %s3774_s1 }
0x1c29   :  { %3644 = vrot.lane.b32.xlu0 %v3623_v3, %s3774_s1  ;;  %2883 = vrot.lane.b32.xlu1 %v3037_v1, %s3774_s1 }
0x1c2d   :  { %2794 = vrot.lane.b32.xlu0 %v3716_v18, %s3774_s1 }
0x1c94   :  { %v2645_v6 = vpop.xlane.xlu0 %2644 }
0x1c95   :  { %v2647_v4 = vmul.f32 0.03125, %v2645_v6  ;;  %v2642_v8 = vpop.xlane.xlu1 %2641 }
0x1c96   :  { %v2646_v61 = vmul.f32 0.03125, %v2642_v8 }
0x1c97   :  { %v2649_v9 = vadd.f32 1e-12, %v2647_v4 }
0x1c98   :  { %v2648_v10 = vadd.f32 1e-12, %v2646_v61  ;;  %v3625_v11 = vpop.permute.xlu0 %3624 }
0x1c99   :  { %3710 = vrsqrt.f32 %v2649_v9  ;;  %v3627_v33 = vunpack.i.h.bf16 %v3625_v11  ;;  %v3626_v12 = vunpack.i.l.bf16 %v3625_v11  ;;  %v2670_v22 = vpop.permute.xlu1 %2669 }
0x1c9a   :  { %3712 = vrsqrt.f32 %v2648_v10 }
0x1c9b   :  { %v3527_v13 = vpack.c.bf16 %v3627_v33, %v3626_v12 }
0x1c9c   :  { %v3630_v2 = vpop.permute.xlu0 %3629 }
0x1c9d   :  { %v3632_v14 = vunpack.i.h.bf16 %v3630_v2  ;;  %v3631_v48 = vunpack.i.l.bf16 %v3630_v2  ;;  %3528 = vmatpush3.bf16.msra.mxu1 %v3527_v13  ;;  %v2706_v28 = vpop.permute.xlu1 %2705 }
0x1c9e   :  { %3529 = vmatprep.subr.bf16.mxu1 %v3780_v52 }
0x1c9f   :  { %v3530_v16 = vpack.c.bf16 %v3632_v14, %v3631_v48 }
0x1ca0   :  { %v3635_v29 = vpop.permute.xlu0 %3634 }
0x1ca1   :  { %3531 = vmatpush3.bf16.msra.mxu1 %v3530_v16  ;;  %v3640_v30 = vpop.permute.xlu1 %3639  ;;  %v3637_v35 = vunpack.i.h.bf16 %v3635_v29  ;;  %v3636_v44 = vunpack.i.l.bf16 %v3635_v29 }
0x1ca2   :  { %3532 = vmatprep.subr.bf16.mxu1 %v3780_v52  ;;  %v3642_v36 = vunpack.i.h.bf16 %v3640_v30  ;;  %v3641_v43 = vunpack.i.l.bf16 %v3640_v30 }
0x1ca3   :  { %v3711_v17 = vpop.eup %3710  ;;  %v3533_v37 = vpack.c.bf16 %v3637_v35, %v3636_v44 }
0x1ca4   :  { %v3713_v19 = vpop.eup %3712  ;;  %v2653_v20 = vmul.f32 %v3711_v17, %v2637_v56  ;;  %v3536_v38 = vpack.c.bf16 %v3642_v36, %v3641_v43  ;;  %v3645_v39 = vpop.permute.xlu0 %3644 }
0x1ca5   :  { %v2652_v21 = vmul.f32 %v3713_v19, %v2636_v57  ;;  %v3650_v40 = vpop.permute.xlu1 %3649  ;;  %v3647_v41 = vunpack.i.h.bf16 %v3645_v39  ;;  %v3646_v42 = vunpack.i.l.bf16 %v3645_v39 }
0x1ca6   :  { %v2663_v34 = vmul.f32 %v2660_v7, %v2653_v20  ;;  %v3652_v46 = vunpack.i.h.bf16 %v3650_v40  ;;  %v3651_v47 = vunpack.i.l.bf16 %v3650_v40 }
0x1ca7   :  { %v2662_v23 = vmul.f32 %v2660_v7, %v2652_v21 }
0x1ca8   :  { %v2673_v31 = vadd.f32 %v2670_v22, %v2663_v34  ;;  %v3542_v49 = vpack.c.bf16 %v3652_v46, %v3651_v47  ;;  %v2795_v55 = vpop.permute.xlu0 %2794 }
0x1ca9   :  { %v2672_v25 = vadd.f32 %v2670_v22, %v2662_v23  ;;  %v2884_v24 = vpop.permute.xlu1 %2883 }
0x1caa   :  { %v2675_v26 = vrot.slane %v2673_v31, 7 }
0x1cac   :  { %v2678_v27 = vsel %vm2677_vm7, %v2672_v25, %v2675_v26 }
0x1cad   :  { %3390 = vmatmul.mubr.msk.f32.vlgmr.msra.gmra.mrb[34].mxu1 %vm189_vm2, %v2678_v27 }
0x1cae   :  { %3400 = vmatprep.mubr.msk.f32.mxu1 %vm3773_vm3, %v3772_v45  ;;  %3534 = vmatpush3.bf16.msra.mxu1 %v3533_v37  ;;  %v3539_v45 = vpack.c.bf16 %v3647_v41, %v3646_v42 }
0x1caf   :  { %3535 = vmatprep.subr.bf16.mxu1 %v3780_v52 }
0x1cb0   :  { %3540 = vmatpush3.bf16.msra.mxu0 %v3539_v45 }
0x1cb1   :  { %3541 = vmatprep.subr.bf16.mxu0 %v3780_v52 }
0x1cb2   :  { %3537 = vmatpush3.bf16.msra.mxu1 %v3536_v38 }
0x1cb4   :  { %3543 = vmatpush3.bf16.msra.mxu0 %v3542_v49 }
0x1d80   :  { %v2777_v50 = vpop.f32.mrb[34].mxu1 }
0x1d81   :  { %v2778_v51 = vadd.f32 %v2777_v50, %v2706_v28  ;;  %v3391_v53 = vpop.f32.mrb[35].mxu1 }
0x1d83   :  { %3714 = vtanh.f32 %v2778_v51 }
0x1d8d   :  { %v3715_v54 = vpop.eup %3714 }
0x1d8e   :  { %3401 = vmatmul.mubr.msk.f32.vlgmr.msra.gmra.mrb[36].mxu1 %vm189_vm2, %v3715_v54 }
0x1e61   :  { %v2866_v56 = vpop.f32.mrb[36].mxu1 }
0x1e62   :  { %v2867_v57 = vadd.f32 %v2866_v56, %v2795_v55  ;;  %v3402_v58 = vpop.f32.mrb[37].mxu1 }
0x1e64   :  { %v2870_v15 = vmax.f32 %v2867_v57, 0.0 }
0x1e66   :  { %3412 = vmatmul.mubr.msk.f32.vlgmr.msra.gmra.mrb[16].mxu0 %vm189_vm2, %v2870_v15 }
0x1f39   :  { %v2955_v59 = vpop.f32.mrb[16].mxu0 }
0x1f3a   :  { %v2956_v32 = vadd.f32 %v2955_v59, %v2884_v24  ;;  %v3413_v60 = vpop.f32.mrb[17].mxu0 }
0x1f3c   :  { %2960 = vst.msk [vmem:[#allocation5] sm:$0x3] %vm2959_vm8, %v2956_v32 }
0x1f3d   :  { %3750 = shalt.err (!%p3747_p12)
}
0x1f3e   :  { %s3751_s14 = scalar_lea.hbm %s4154_s3, 32 }
0x1f3f   :  { %p3752_p13 = scmp.ne.s32.totalorder %s4154_s3, %s3751_s14  ;;  %p3755_p0 = scmp.lt.u32.totalorder %s3751_s14, %s4154_s3 }
0x1f41   :  { %p3757_p1 = pnand %p3755_p0, %p3752_p13 }
0x1f43   :  { %3760 = shalt.err (!%p3757_p1)
}
0x1f44   :  { %2970 = dma.vmem_to_hbm [thread:$0]  %s2968_s10, 32, %s4154_s3, [#allocation4]  }
0x1f45   :  { %3763 = dma.done.wait [#allocation4], 32  }
0x1f46   :  { %3764 = vsyncadd [#allocation4], 4294967264 }
0x1f47   :  { %2974 = vsyncpa [#allocation3], 1 }
0x1f48   :  { %2975 = vsyncpa [#allocation4], 1 }

</bundles_post_ra>
